<compile_context>
chip_gen: v5e
topology: v5e:2x2
jax: 0.10.0
libtpu: 0.0.40
codegen_flags: <defaults>
</compile_context>

<pallas_src>
import jax
import jax.numpy as jnp
from jax import lax
from jax.experimental import pallas as pl
from jax.experimental.pallas import tpu as pltpu

# ----------------------------------------------------------------------------
# Small configuration consistent with the module (scaled down from defaults)
# ----------------------------------------------------------------------------
INPUT_SIZE = 8                                        # "input_size" (H features)
TDS_GROUPS = ({'channels': 2, 'num_blocks': 1},
              {'channels': 4, 'num_blocks': 1})
KERNEL_SIZE = 5
PAD = KERNEL_SIZE // 2
N_GUMBEL = 8                                          # n_gumbel_units
N_CLASS = 16                                          # n_class
EPS = 1e-5                                            # InstanceNorm eps
LPAD = 8                                              # sublane-aligned scratch offset
OUT_LANES = 128                                       # lane-dense packed output slab


# ----------------------------------------------------------------------------
# In-kernel helpers
# ----------------------------------------------------------------------------
def _instnorm(z, gamma, beta):
    # InstanceNorm1d: normalize over W (axis 0) per channel, biased variance.
    mean = jnp.mean(z, axis=0, keepdims=True)
    var = jnp.mean((z - mean) ** 2, axis=0, keepdims=True)
    return (z - mean) * lax.rsqrt(var + EPS) * gamma + beta


def _fill_padded(pad_ref, x):
    # scratch rows [LPAD, LPAD + W) = x, everything else zero (aligned store).
    pad_ref[...] = jnp.zeros_like(pad_ref)
    pad_ref[pl.ds(LPAD, x.shape[0]), :] = x


def _tap(pad_ref, k, w):
    # rows of the conceptually zero-padded (pad=PAD) sequence, window start k.
    return pad_ref[pl.ds(LPAD - PAD + k, w), :]


def _front_stage(x, pad_ref, w_ref, vec_ref, w_out):
    # Conv1d(c_in -> c_out, K, stride=2, pad=PAD) + ReLU + InstanceNorm1d(affine).
    w_in, _ = x.shape
    _fill_padded(pad_ref, x)
    patches = jnp.concatenate(
        [_tap(pad_ref, k, w_in) for k in range(KERNEL_SIZE)],
        axis=-1).astype(jnp.bfloat16)                              # (W, K*Cin)
    # stride-2 row selection as an exact 0/1 matmul (in-kernel strided im2col).
    rows = lax.broadcasted_iota(jnp.int32, (w_out, w_in), 0)
    cols = lax.broadcasted_iota(jnp.int32, (w_out, w_in), 1)
    sel = (cols == 2 * rows).astype(jnp.bfloat16)
    p_ds = jnp.dot(sel, patches, preferred_element_type=jnp.float32)
    y = jnp.dot(p_ds.astype(jnp.bfloat16), w_ref[...],
                preferred_element_type=jnp.float32)                # (Wout, Cout)
    vecs = vec_ref[...]                                            # (3, Cout): bias, gamma, beta
    y = jnp.maximum(y + vecs[0:1, :], 0.0)
    return _instnorm(y, vecs[1:2, :], vecs[2:3, :])


def _tds_stage(z, pad_ref, w2e_ref, vec_ref, fc1_ref, fc2_ref, c):
    # TDSBlock: grouped Conv2d(C,C,(1,K)) + ReLU + residual + InstanceNorm
    #           + Linear/ReLU/Linear + residual + InstanceNorm.
    # Channel layout is c-major (CH index = c*H + h), matching view(B, C, H, W).
    w, ch = z.shape
    h = ch // c
    _fill_padded(pad_ref, z)
    vecs = vec_ref[...]            # (7, CH): conv_b, g1, b1, fc1_b, fc2_b, g2, b2
    w2e = w2e_ref[...]             # (K*C, CH) f32: row k*C+ci = w2[k,ci,:] repeated per h
    # grouped conv as K*C lane-broadcast multiply-adds (no block-diag zero MACs).
    # TODO(synk): for large C this should become a (W*H, K*C) x (K*C, C) MXU GEMM.
    conv = jnp.zeros((w, ch), jnp.float32)
    for k in range(KERNEL_SIZE):
        tap = _tap(pad_ref, k, w)                                  # (W, CH)
        for ci in range(c):
            blk = jnp.concatenate([tap[:, ci * h:(ci + 1) * h]] * c, axis=-1)
            conv = conv + w2e[k * c + ci:k * c + ci + 1, :] * blk
    conv = jnp.maximum(conv + vecs[0:1, :], 0.0)
    z1 = _instnorm(conv + z, vecs[1:2, :], vecs[2:3, :])
    hid = jnp.maximum(
        jnp.dot(z1.astype(jnp.bfloat16), fc1_ref[...],
                preferred_element_type=jnp.float32) + vecs[3:4, :], 0.0)
    hid = jnp.dot(hid.astype(jnp.bfloat16), fc2_ref[...],
                  preferred_element_type=jnp.float32) + vecs[4:5, :]
    return _instnorm(hid + z1, vecs[5:6, :], vecs[6:7, :])


def _head_stage(emb, gnoise, wb_ref, bb_ref, wl_ref, bl_ref, temp):
    # bottleneck Linear -> gumbel-softmax (soft, tau=temp) -> output Linear.
    logits = jnp.dot(emb.astype(jnp.bfloat16), wb_ref[...],
                     preferred_element_type=jnp.float32) + bb_ref[...]
    y = (logits + gnoise) * (1.0 / temp)
    y = y - jnp.max(y, axis=-1, keepdims=True)
    ey = jnp.exp(y)
    enc = ey * pl.reciprocal(jnp.sum(ey, axis=-1, keepdims=True), approx=True)
    out = jnp.dot(enc.astype(jnp.bfloat16), wl_ref[...],
                  preferred_element_type=jnp.float32) + bl_ref[...]
    return logits, out


# ----------------------------------------------------------------------------
# Fused forward wrapper (one pallas_call for the whole network)
# ----------------------------------------------------------------------------
def gumbel_tds_forward(params, inputs_ncw, gumbel_noise, temp=1.0):
    """Fused Pallas forward. inputs_ncw: (B, input_size, W) as in the module."""
    x = jnp.transpose(inputs_ncw, (0, 2, 1)).astype(jnp.float32)   # (B, W, C0)
    B, w0, c0 = x.shape

    # static shape plan through the network
    plan = []
    w_cur, c_cur = w0, c0
    for grp in TDS_GROUPS:
        ch = INPUT_SIZE * grp['channels']
        w_out = (w_cur + 2 * PAD - KERNEL_SIZE) // 2 + 1
        plan.append(dict(c=grp['channels'], w_in=w_cur, c_in=c_cur,
                         ch=ch, w_out=w_out, n_blocks=grp['num_blocks']))
        w_cur, c_cur = w_out, ch
    wf = w_cur

    def full2d(arr):
        return pl.BlockSpec(arr.shape, lambda b: (0, 0))

    flat_inputs = [x, gumbel_noise.astype(jnp.float32)]
    in_specs = [pl.BlockSpec((None, w0, c0), lambda b: (b, 0, 0)),
                pl.BlockSpec((None, wf, N_GUMBEL), lambda b: (b, 0, 0))]
    scratch_shapes = []

    for gi, sp in enumerate(plan):
        gp = params['groups'][gi]
        for arr in (gp['conv_w'], gp['front_vecs']):
            flat_inputs.append(arr)
            in_specs.append(full2d(arr))
        scratch_shapes.append(
            pltpu.VMEM((sp['w_in'] + LPAD + PAD, sp['c_in']), jnp.float32))
        for bp in gp['blocks']:
            # lane-expanded grouped-conv weight: (K*C, CH), row k*C+ci, lane c_out*H+h
            w2e = jnp.repeat(bp['w2'], INPUT_SIZE, axis=2).reshape(
                KERNEL_SIZE * sp['c'], sp['ch'])
            for arr in (w2e, bp['blk_vecs'], bp['fc1_w'], bp['fc2_w']):
                flat_inputs.append(arr)
                in_specs.append(full2d(arr))
            scratch_shapes.append(
                pltpu.VMEM((sp['w_out'] + LPAD + PAD, sp['ch']), jnp.float32))
    for arr in (params['bottleneck_w'], params['bottleneck_b'],
                params['linear_w'], params['linear_b']):
        flat_inputs.append(arr)
        in_specs.append(full2d(arr))

    n_in = len(flat_inputs)

    def kernel(*refs):
        in_refs = refs[:n_in]
        out_ref = refs[n_in]
        scratch = refs[n_in + 1:]
        it = iter(in_refs)
        sc = iter(scratch)
        x_ref = next(it)
        gn_ref = next(it)
        cur = x_ref[...]
        for sp in plan:
            w_ref, vec_ref = next(it), next(it)
            cur = _front_stage(cur, next(sc), w_ref, vec_ref, sp['w_out'])
            for _ in range(sp['n_blocks']):
                w2e_ref, bvec_ref, fc1_ref, fc2_ref = (next(it), next(it),
                                                       next(it), next(it))
                cur = _tds_stage(cur, next(sc), w2e_ref, bvec_ref,
                                 fc1_ref, fc2_ref, sp['c'])
        wb_ref, bb_ref, wl_ref, bl_ref = next(it), next(it), next(it), next(it)
        in_logits, out_logits = _head_stage(cur, gn_ref[...],
                                            wb_ref, bb_ref, wl_ref, bl_ref, temp)
        pad_lanes = OUT_LANES - N_GUMBEL - N_CLASS
        out_ref[...] = jnp.concatenate(
            [in_logits, out_logits, jnp.zeros((wf, pad_lanes), jnp.float32)],
            axis=-1)

    slab = pl.pallas_call(
        kernel,
        out_shape=jax.ShapeDtypeStruct((B, wf, OUT_LANES), jnp.float32),
        grid=(B,),
        in_specs=in_specs,
        out_specs=pl.BlockSpec((None, wf, OUT_LANES), lambda b: (b, 0, 0)),
        scratch_shapes=scratch_shapes,
        compiler_params=pltpu.CompilerParams(dimension_semantics=("parallel",)),
    )(*flat_inputs)

    in_logits = slab[:, :, :N_GUMBEL]
    out_logits = slab[:, :, N_GUMBEL:N_GUMBEL + N_CLASS]
    return in_logits, out_logits


# ----------------------------------------------------------------------------
# Parameters
# ----------------------------------------------------------------------------
def init_params(key):
    def nrm(k, shape, scale=0.1):
        return scale * jax.random.normal(k, shape, jnp.float32)

    ki = iter(jax.random.split(key, 64))
    params = {'groups': []}
    in_c = INPUT_SIZE
    for grp in TDS_GROUPS:
        C = grp['channels']
        CH = INPUT_SIZE * C
        gp = {
            # Conv1d(in_c -> CH, K) weight, rows ordered k-major then in-channel.
            'conv_w': nrm(next(ki), (KERNEL_SIZE * in_c, CH)).astype(jnp.bfloat16),
            'front_vecs': jnp.concatenate([
                nrm(next(ki), (1, CH)),            # conv bias
                1.0 + nrm(next(ki), (1, CH)),      # InstanceNorm gamma
                nrm(next(ki), (1, CH)),            # InstanceNorm beta
            ], axis=0),
            'blocks': [],
        }
        for _ in range(grp['num_blocks']):
            w2 = nrm(next(ki), (KERNEL_SIZE, C, C))     # grouped Conv2d taps [k, ci, co]
            conv_b = jnp.repeat(nrm(next(ki), (1, C)), INPUT_SIZE, axis=1)  # c-major (1, CH)
            gp['blocks'].append({
                'w2': w2,
                'blk_vecs': jnp.concatenate([
                    conv_b,
                    1.0 + nrm(next(ki), (1, CH)),  # g1
                    nrm(next(ki), (1, CH)),        # b1
                    nrm(next(ki), (1, CH)),        # fc1_b
                    nrm(next(ki), (1, CH)),        # fc2_b
                    1.0 + nrm(next(ki), (1, CH)),  # g2
                    nrm(next(ki), (1, CH)),        # b2
                ], axis=0),
                'fc1_w': nrm(next(ki), (CH, CH)).astype(jnp.bfloat16),
                'fc2_w': nrm(next(ki), (CH, CH)).astype(jnp.bfloat16),
            })
        params['groups'].append(gp)
        in_c = CH
    params['bottleneck_w'] = nrm(next(ki), (in_c, N_GUMBEL)).astype(jnp.bfloat16)
    params['bottleneck_b'] = nrm(next(ki), (1, N_GUMBEL))
    params['linear_w'] = nrm(next(ki), (N_GUMBEL, N_CLASS)).astype(jnp.bfloat16)
    params['linear_b'] = nrm(next(ki), (1, N_CLASS))
    return params


# ----------------------------------------------------------------------------
# Pure-JAX reference (same math, same parameter layout) for a sanity check
# ----------------------------------------------------------------------------
def reference_forward(params, inputs_ncw, gumbel_noise, temp=1.0):
    def instnorm(z, g, b):
        m = jnp.mean(z, axis=1, keepdims=True)
        v = jnp.mean((z - m) ** 2, axis=1, keepdims=True)
        return (z - m) * lax.rsqrt(v + EPS) * g + b

    def bdot(a, b):
        return jnp.einsum('bwk,kc->bwc', a.astype(jnp.bfloat16),
                          b.astype(jnp.bfloat16),
                          preferred_element_type=jnp.float32)

    cur = jnp.transpose(inputs_ncw, (0, 2, 1)).astype(jnp.float32)
    for gi, grp in enumerate(TDS_GROUPS):
        gp = params['groups'][gi]
        B, W, Cin = cur.shape
        Wout = (W + 2 * PAD - KERNEL_SIZE) // 2 + 1
        xp = jnp.pad(cur, ((0, 0), (PAD, PAD), (0, 0)))
        patches = jnp.concatenate(
            [xp[:, k:k + 2 * Wout:2, :] for k in range(KERNEL_SIZE)], axis=-1)
        fv = gp['front_vecs']
        y = jnp.maximum(bdot(patches, gp['conv_w']) + fv[0:1, :], 0.0)
        cur = instnorm(y, fv[1:2, :], fv[2:3, :])
        C, H = grp['channels'], INPUT_SIZE
        for bp in gp['blocks']:
            _, W2, CH = cur.shape
            zp = jnp.pad(cur, ((0, 0), (PAD, PAD), (0, 0)))
            zp4 = zp.reshape(B, W2 + 2 * PAD, C, H)
            taps = jnp.stack([zp4[:, k:k + W2] for k in range(KERNEL_SIZE)], axis=0)
            conv = jnp.einsum('kbwch,kcd->bwdh', taps, bp['w2']).reshape(B, W2, CH)
            bv = bp['blk_vecs']
            conv = jnp.maximum(conv + bv[0:1, :], 0.0)
            z1 = instnorm(conv + cur, bv[1:2, :], bv[2:3, :])
            hid = jnp.maximum(bdot(z1, bp['fc1_w']) + bv[3:4, :], 0.0)
            hid = bdot(hid, bp['fc2_w']) + bv[4:5, :]
            cur = instnorm(hid + z1, bv[5:6, :], bv[6:7, :])
    logits = bdot(cur, params['bottleneck_w']) + params['bottleneck_b']
    enc = jax.nn.softmax((logits + gumbel_noise) / temp, axis=-1)
    out = bdot(enc, params['linear_w']) + params['linear_b']
    return logits, out


# ----------------------------------------------------------------------------
if __name__ == "__main__":
    key = jax.random.PRNGKey(0)
    pkey, xkey, gkey = jax.random.split(key, 3)

    params = init_params(pkey)

    B, W_IN = 2, 16
    x = jax.random.normal(xkey, (B, INPUT_SIZE, W_IN), jnp.float32)  # NCW input

    # downsampled width after the stride-2 front convs
    Wf = W_IN
    for _ in TDS_GROUPS:
        Wf = (Wf + 2 * PAD - KERNEL_SIZE) // 2 + 1
    gnoise = jax.random.gumbel(gkey, (B, Wf, N_GUMBEL), jnp.float32)

    in_logits, out_logits = gumbel_tds_forward(params, x, gnoise, temp=1.0)
    jax.block_until_ready((in_logits, out_logits))

    ref_in, ref_out = reference_forward(params, x, gnoise, temp=1.0)
    assert in_logits.shape == (B, Wf, N_GUMBEL)
    assert out_logits.shape == (B, Wf, N_CLASS)
    assert bool(jnp.all(jnp.isfinite(in_logits))) and bool(jnp.all(jnp.isfinite(out_logits)))
    assert jnp.allclose(in_logits, ref_in, atol=2e-2, rtol=2e-2)
    assert jnp.allclose(out_logits, ref_out, atol=2e-2, rtol=2e-2)

    print("KERNEL_OK")
</pallas_src>

<mosaic_0001>
module attributes {stable_mosaic.version = 11 : i64} {
  func.func @kernel(%arg0: i32, %arg1: memref<1x16x8xf32, #tpu.memory_space<vmem>>, %arg2: memref<1x4x8xf32, #tpu.memory_space<vmem>>, %arg3: memref<40x16xbf16, #tpu.memory_space<vmem>>, %arg4: memref<3x16xf32, #tpu.memory_space<vmem>>, %arg5: memref<10x16xf32, #tpu.memory_space<vmem>>, %arg6: memref<7x16xf32, #tpu.memory_space<vmem>>, %arg7: memref<16x16xbf16, #tpu.memory_space<vmem>>, %arg8: memref<16x16xbf16, #tpu.memory_space<vmem>>, %arg9: memref<80x32xbf16, #tpu.memory_space<vmem>>, %arg10: memref<3x32xf32, #tpu.memory_space<vmem>>, %arg11: memref<20x32xf32, #tpu.memory_space<vmem>>, %arg12: memref<7x32xf32, #tpu.memory_space<vmem>>, %arg13: memref<32x32xbf16, #tpu.memory_space<vmem>>, %arg14: memref<32x32xbf16, #tpu.memory_space<vmem>>, %arg15: memref<32x8xbf16, #tpu.memory_space<vmem>>, %arg16: memref<1x8xf32, #tpu.memory_space<vmem>>, %arg17: memref<8x16xbf16, #tpu.memory_space<vmem>>, %arg18: memref<1x16xf32, #tpu.memory_space<vmem>>, %arg19: memref<1x4x128xf32, #tpu.memory_space<vmem>>, %arg20: memref<26x8xf32, #tpu.memory_space<vmem>>, %arg21: memref<18x16xf32, #tpu.memory_space<vmem>>, %arg22: memref<18x16xf32, #tpu.memory_space<vmem>>, %arg23: memref<14x32xf32, #tpu.memory_space<vmem>>) attributes {dimension_semantics = [#tpu.dimension_semantics<parallel>], iteration_bounds = array<i64: 2>, scalar_prefetch = 0 : i64, scratch_operands = 4 : i64, tpu.core_type = #tpu.core_type<tc>, window_params = [{transform_indices = @transform_0, window_bounds = array<i64: 1, 16, 8>}, {transform_indices = @transform_1, window_bounds = array<i64: 1, 4, 8>}, {pipeline_mode = #tpu.pipeline_mode<synchronous>, transform_indices = @transform_2, window_bounds = array<i64: 40, 16>}, {pipeline_mode = #tpu.pipeline_mode<synchronous>, transform_indices = @transform_3, window_bounds = array<i64: 3, 16>}, {pipeline_mode = #tpu.pipeline_mode<synchronous>, transform_indices = @transform_4, window_bounds = array<i64: 10, 16>}, {pipeline_mode = #tpu.pipeline_mode<synchronous>, transform_indices = @transform_5, window_bounds = array<i64: 7, 16>}, {pipeline_mode = #tpu.pipeline_mode<synchronous>, transform_indices = @transform_6, window_bounds = array<i64: 16, 16>}, {pipeline_mode = #tpu.pipeline_mode<synchronous>, transform_indices = @transform_7, window_bounds = array<i64: 16, 16>}, {pipeline_mode = #tpu.pipeline_mode<synchronous>, transform_indices = @transform_8, window_bounds = array<i64: 80, 32>}, {pipeline_mode = #tpu.pipeline_mode<synchronous>, transform_indices = @transform_9, window_bounds = array<i64: 3, 32>}, {pipeline_mode = #tpu.pipeline_mode<synchronous>, transform_indices = @transform_10, window_bounds = array<i64: 20, 32>}, {pipeline_mode = #tpu.pipeline_mode<synchronous>, transform_indices = @transform_11, window_bounds = array<i64: 7, 32>}, {pipeline_mode = #tpu.pipeline_mode<synchronous>, transform_indices = @transform_12, window_bounds = array<i64: 32, 32>}, {pipeline_mode = #tpu.pipeline_mode<synchronous>, transform_indices = @transform_13, window_bounds = array<i64: 32, 32>}, {pipeline_mode = #tpu.pipeline_mode<synchronous>, transform_indices = @transform_14, window_bounds = array<i64: 32, 8>}, {pipeline_mode = #tpu.pipeline_mode<synchronous>, transform_indices = @transform_15, window_bounds = array<i64: 1, 8>}, {pipeline_mode = #tpu.pipeline_mode<synchronous>, transform_indices = @transform_16, window_bounds = array<i64: 8, 16>}, {pipeline_mode = #tpu.pipeline_mode<synchronous>, transform_indices = @transform_17, window_bounds = array<i64: 1, 16>}, {transform_indices = @transform_18, window_bounds = array<i64: 1, 4, 128>}]} {
    %c0 = arith.constant 0 : index
    %c0_0 = arith.constant 0 : index
    %c0_1 = arith.constant 0 : index
    %0 = vector.load %arg1[%c0, %c0_0, %c0_1] : memref<1x16x8xf32, #tpu.memory_space<vmem>>, vector<1x16x8xf32>
    %1 = vector.shape_cast %0 : vector<1x16x8xf32> to vector<16x8xf32>
    %cst = arith.constant 0.000000e+00 : f32
    %2 = vector.broadcast %cst : f32 to vector<26x8xf32>
    %c0_2 = arith.constant 0 : index
    %c0_3 = arith.constant 0 : index
    %3 = vector.load %arg20[%c0_2, %c0_3] : memref<26x8xf32, #tpu.memory_space<vmem>>, vector<26x8xf32>
    tpu.vector_store %arg20[%c0_2, %c0_3], %2 {strides = array<i32>} : memref<26x8xf32, #tpu.memory_space<vmem>>, vector<26x8xf32>,
    %c8 = arith.constant 8 : index
    %c0_4 = arith.constant 0 : index
    %4 = vector.load %arg20[%c8, %c0_4] : memref<26x8xf32, #tpu.memory_space<vmem>>, vector<16x8xf32>
    tpu.vector_store %arg20[%c8, %c0_4], %1 {strides = array<i32>} : memref<26x8xf32, #tpu.memory_space<vmem>>, vector<16x8xf32>,
    %c6 = arith.constant 6 : index
    %c0_5 = arith.constant 0 : index
    %5 = vector.load %arg20[%c6, %c0_5] : memref<26x8xf32, #tpu.memory_space<vmem>>, vector<16x8xf32>
    %c7 = arith.constant 7 : index
    %c0_6 = arith.constant 0 : index
    %6 = vector.load %arg20[%c7, %c0_6] : memref<26x8xf32, #tpu.memory_space<vmem>>, vector<16x8xf32>
    %c8_7 = arith.constant 8 : index
    %c0_8 = arith.constant 0 : index
    %7 = vector.load %arg20[%c8_7, %c0_8] : memref<26x8xf32, #tpu.memory_space<vmem>>, vector<16x8xf32>
    %c9 = arith.constant 9 : index
    %c0_9 = arith.constant 0 : index
    %8 = vector.load %arg20[%c9, %c0_9] : memref<26x8xf32, #tpu.memory_space<vmem>>, vector<16x8xf32>
    %c10 = arith.constant 10 : index
    %c0_10 = arith.constant 0 : index
    %9 = vector.load %arg20[%c10, %c0_10] : memref<26x8xf32, #tpu.memory_space<vmem>>, vector<16x8xf32>
    %10 = tpu.concatenate %5, %6, %7, %8, %9 in 1 : vector<16x8xf32>, vector<16x8xf32>, vector<16x8xf32>, vector<16x8xf32>, vector<16x8xf32> -> vector<16x40xf32>
    %11 = arith.truncf %10 : vector<16x40xf32> to vector<16x40xbf16>
    %12 = tpu.iota {dimensions = array<i32: 0>} : vector<8x16xi32>
    %13 = tpu.iota {dimensions = array<i32: 1>} : vector<8x16xi32>
    %c2_i32 = arith.constant 2 : i32
    %14 = vector.broadcast %c2_i32 : i32 to vector<8x16xi32>
    %15 = arith.muli %14, %12 : vector<8x16xi32>
    %16 = arith.cmpi eq, %13, %15 : vector<8x16xi32>
    %17 = arith.extui %16 : vector<8x16xi1> to vector<8x16xi32>
    %18 = arith.sitofp %17 : vector<8x16xi32> to vector<8x16xf32>
    %19 = arith.truncf %18 : vector<8x16xf32> to vector<8x16xbf16>
    %cst_11 = arith.constant dense<0.000000e+00> : vector<8x40xf32>
    %20 = tpu.matmul %19, %11, %cst_11 {dimension_numbers = #tpu.dot_dimension_numbers<[1], [0], [0], [1], [0, 0, 1, 1], [], []>} : vector<8x16xbf16>, vector<16x40xbf16>, vector<8x40xf32> -> vector<8x40xf32>
    %21 = arith.truncf %20 : vector<8x40xf32> to vector<8x40xbf16>
    %c0_12 = arith.constant 0 : index
    %c0_13 = arith.constant 0 : index
    %22 = vector.load %arg3[%c0_12, %c0_13] : memref<40x16xbf16, #tpu.memory_space<vmem>>, vector<40x16xbf16>
    %cst_14 = arith.constant dense<0.000000e+00> : vector<8x16xf32>
    %23 = tpu.matmul %21, %22, %cst_14 {dimension_numbers = #tpu.dot_dimension_numbers<[1], [0], [0], [1], [0, 0, 1, 1], [], []>} : vector<8x40xbf16>, vector<40x16xbf16>, vector<8x16xf32> -> vector<8x16xf32>
    %c0_15 = arith.constant 0 : index
    %c0_16 = arith.constant 0 : index
    %24 = vector.load %arg4[%c0_15, %c0_16] : memref<3x16xf32, #tpu.memory_space<vmem>>, vector<3x16xf32>
    %25 = vector.extract_strided_slice %24 {offsets = [0, 0], sizes = [1, 16], strides = [1, 1]} : vector<3x16xf32> to vector<1x16xf32>
    %26 = vector.broadcast %25 : vector<1x16xf32> to vector<8x16xf32>
    %27 = arith.addf %23, %26 : vector<8x16xf32>
    %cst_17 = arith.constant 0.000000e+00 : f32
    %28 = vector.broadcast %cst_17 : f32 to vector<8x16xf32>
    %29 = arith.maximumf %27, %28 : vector<8x16xf32>
    %30 = vector.extract_strided_slice %24 {offsets = [1, 0], sizes = [1, 16], strides = [1, 1]} : vector<3x16xf32> to vector<1x16xf32>
    %31 = vector.extract_strided_slice %24 {offsets = [2, 0], sizes = [1, 16], strides = [1, 1]} : vector<3x16xf32> to vector<1x16xf32>
    %cst_18 = arith.constant dense<0.000000e+00> : vector<16xf32>
    %32 = vector.multi_reduction <add>, %29, %cst_18 [0] : vector<8x16xf32> to vector<16xf32>
    %33 = vector.shape_cast %32 : vector<16xf32> to vector<1x16xf32>
    %cst_19 = arith.constant 8.000000e+00 : f32
    %34 = vector.broadcast %cst_19 : f32 to vector<1x16xf32>
    %35 = arith.divf %33, %34 : vector<1x16xf32>
    %36 = vector.broadcast %35 : vector<1x16xf32> to vector<8x16xf32>
    %37 = arith.subf %29, %36 : vector<8x16xf32>
    %38 = arith.mulf %37, %37 : vector<8x16xf32>
    %cst_20 = arith.constant dense<0.000000e+00> : vector<16xf32>
    %39 = vector.multi_reduction <add>, %38, %cst_20 [0] : vector<8x16xf32> to vector<16xf32>
    %40 = vector.shape_cast %39 : vector<16xf32> to vector<1x16xf32>
    %cst_21 = arith.constant 8.000000e+00 : f32
    %41 = vector.broadcast %cst_21 : f32 to vector<1x16xf32>
    %42 = arith.divf %40, %41 : vector<1x16xf32>
    %43 = vector.broadcast %35 : vector<1x16xf32> to vector<8x16xf32>
    %44 = arith.subf %29, %43 : vector<8x16xf32>
    %cst_22 = arith.constant 9.99999974E-6 : f32
    %45 = vector.broadcast %cst_22 : f32 to vector<1x16xf32>
    %46 = arith.addf %42, %45 : vector<1x16xf32>
    %47 = math.rsqrt %46 : vector<1x16xf32>
    %48 = vector.broadcast %47 : vector<1x16xf32> to vector<8x16xf32>
    %49 = arith.mulf %44, %48 : vector<8x16xf32>
    %50 = vector.broadcast %30 : vector<1x16xf32> to vector<8x16xf32>
    %51 = arith.mulf %49, %50 : vector<8x16xf32>
    %52 = vector.broadcast %31 : vector<1x16xf32> to vector<8x16xf32>
    %53 = arith.addf %51, %52 : vector<8x16xf32>
    %cst_23 = arith.constant 0.000000e+00 : f32
    %54 = vector.broadcast %cst_23 : f32 to vector<18x16xf32>
    %c0_24 = arith.constant 0 : index
    %c0_25 = arith.constant 0 : index
    %55 = vector.load %arg21[%c0_24, %c0_25] : memref<18x16xf32, #tpu.memory_space<vmem>>, vector<18x16xf32>
    tpu.vector_store %arg21[%c0_24, %c0_25], %54 {strides = array<i32>} : memref<18x16xf32, #tpu.memory_space<vmem>>, vector<18x16xf32>,
    %c8_26 = arith.constant 8 : index
    %c0_27 = arith.constant 0 : index
    %56 = vector.load %arg21[%c8_26, %c0_27] : memref<18x16xf32, #tpu.memory_space<vmem>>, vector<8x16xf32>
    tpu.vector_store %arg21[%c8_26, %c0_27], %53 {strides = array<i32>} : memref<18x16xf32, #tpu.memory_space<vmem>>, vector<8x16xf32>,
    %c0_28 = arith.constant 0 : index
    %c0_29 = arith.constant 0 : index
    %57 = vector.load %arg6[%c0_28, %c0_29] : memref<7x16xf32, #tpu.memory_space<vmem>>, vector<7x16xf32>
    %c0_30 = arith.constant 0 : index
    %c0_31 = arith.constant 0 : index
    %58 = vector.load %arg5[%c0_30, %c0_31] : memref<10x16xf32, #tpu.memory_space<vmem>>, vector<10x16xf32>
    %cst_32 = arith.constant 0.000000e+00 : f32
    %59 = vector.broadcast %cst_32 : f32 to vector<8x16xf32>
    %c6_33 = arith.constant 6 : index
    %c0_34 = arith.constant 0 : index
    %60 = vector.load %arg21[%c6_33, %c0_34] : memref<18x16xf32, #tpu.memory_space<vmem>>, vector<8x16xf32>
    %61 = vector.extract_strided_slice %60 {offsets = [0, 0], sizes = [8, 8], strides = [1, 1]} : vector<8x16xf32> to vector<8x8xf32>
    %62 = tpu.concatenate %61, %61 in 1 : vector<8x8xf32>, vector<8x8xf32> -> vector<8x16xf32>
    %63 = vector.extract_strided_slice %58 {offsets = [0, 0], sizes = [1, 16], strides = [1, 1]} : vector<10x16xf32> to vector<1x16xf32>
    %64 = vector.broadcast %63 : vector<1x16xf32> to vector<8x16xf32>
    %65 = arith.mulf %64, %62 : vector<8x16xf32>
    %66 = arith.addf %59, %65 : vector<8x16xf32>
    %67 = vector.extract_strided_slice %60 {offsets = [0, 8], sizes = [8, 8], strides = [1, 1]} : vector<8x16xf32> to vector<8x8xf32>
    %68 = tpu.concatenate %67, %67 in 1 : vector<8x8xf32>, vector<8x8xf32> -> vector<8x16xf32>
    %69 = vector.extract_strided_slice %58 {offsets = [1, 0], sizes = [1, 16], strides = [1, 1]} : vector<10x16xf32> to vector<1x16xf32>
    %70 = vector.broadcast %69 : vector<1x16xf32> to vector<8x16xf32>
    %71 = arith.mulf %70, %68 : vector<8x16xf32>
    %72 = arith.addf %66, %71 : vector<8x16xf32>
    %c7_35 = arith.constant 7 : index
    %c0_36 = arith.constant 0 : index
    %73 = vector.load %arg21[%c7_35, %c0_36] : memref<18x16xf32, #tpu.memory_space<vmem>>, vector<8x16xf32>
    %74 = vector.extract_strided_slice %73 {offsets = [0, 0], sizes = [8, 8], strides = [1, 1]} : vector<8x16xf32> to vector<8x8xf32>
    %75 = tpu.concatenate %74, %74 in 1 : vector<8x8xf32>, vector<8x8xf32> -> vector<8x16xf32>
    %76 = vector.extract_strided_slice %58 {offsets = [2, 0], sizes = [1, 16], strides = [1, 1]} : vector<10x16xf32> to vector<1x16xf32>
    %77 = vector.broadcast %76 : vector<1x16xf32> to vector<8x16xf32>
    %78 = arith.mulf %77, %75 : vector<8x16xf32>
    %79 = arith.addf %72, %78 : vector<8x16xf32>
    %80 = vector.extract_strided_slice %73 {offsets = [0, 8], sizes = [8, 8], strides = [1, 1]} : vector<8x16xf32> to vector<8x8xf32>
    %81 = tpu.concatenate %80, %80 in 1 : vector<8x8xf32>, vector<8x8xf32> -> vector<8x16xf32>
    %82 = vector.extract_strided_slice %58 {offsets = [3, 0], sizes = [1, 16], strides = [1, 1]} : vector<10x16xf32> to vector<1x16xf32>
    %83 = vector.broadcast %82 : vector<1x16xf32> to vector<8x16xf32>
    %84 = arith.mulf %83, %81 : vector<8x16xf32>
    %85 = arith.addf %79, %84 : vector<8x16xf32>
    %c8_37 = arith.constant 8 : index
    %c0_38 = arith.constant 0 : index
    %86 = vector.load %arg21[%c8_37, %c0_38] : memref<18x16xf32, #tpu.memory_space<vmem>>, vector<8x16xf32>
    %87 = vector.extract_strided_slice %86 {offsets = [0, 0], sizes = [8, 8], strides = [1, 1]} : vector<8x16xf32> to vector<8x8xf32>
    %88 = tpu.concatenate %87, %87 in 1 : vector<8x8xf32>, vector<8x8xf32> -> vector<8x16xf32>
    %89 = vector.extract_strided_slice %58 {offsets = [4, 0], sizes = [1, 16], strides = [1, 1]} : vector<10x16xf32> to vector<1x16xf32>
    %90 = vector.broadcast %89 : vector<1x16xf32> to vector<8x16xf32>
    %91 = arith.mulf %90, %88 : vector<8x16xf32>
    %92 = arith.addf %85, %91 : vector<8x16xf32>
    %93 = vector.extract_strided_slice %86 {offsets = [0, 8], sizes = [8, 8], strides = [1, 1]} : vector<8x16xf32> to vector<8x8xf32>
    %94 = tpu.concatenate %93, %93 in 1 : vector<8x8xf32>, vector<8x8xf32> -> vector<8x16xf32>
    %95 = vector.extract_strided_slice %58 {offsets = [5, 0], sizes = [1, 16], strides = [1, 1]} : vector<10x16xf32> to vector<1x16xf32>
    %96 = vector.broadcast %95 : vector<1x16xf32> to vector<8x16xf32>
    %97 = arith.mulf %96, %94 : vector<8x16xf32>
    %98 = arith.addf %92, %97 : vector<8x16xf32>
    %c9_39 = arith.constant 9 : index
    %c0_40 = arith.constant 0 : index
    %99 = vector.load %arg21[%c9_39, %c0_40] : memref<18x16xf32, #tpu.memory_space<vmem>>, vector<8x16xf32>
    %100 = vector.extract_strided_slice %99 {offsets = [0, 0], sizes = [8, 8], strides = [1, 1]} : vector<8x16xf32> to vector<8x8xf32>
    %101 = tpu.concatenate %100, %100 in 1 : vector<8x8xf32>, vector<8x8xf32> -> vector<8x16xf32>
    %102 = vector.extract_strided_slice %58 {offsets = [6, 0], sizes = [1, 16], strides = [1, 1]} : vector<10x16xf32> to vector<1x16xf32>
    %103 = vector.broadcast %102 : vector<1x16xf32> to vector<8x16xf32>
    %104 = arith.mulf %103, %101 : vector<8x16xf32>
    %105 = arith.addf %98, %104 : vector<8x16xf32>
    %106 = vector.extract_strided_slice %99 {offsets = [0, 8], sizes = [8, 8], strides = [1, 1]} : vector<8x16xf32> to vector<8x8xf32>
    %107 = tpu.concatenate %106, %106 in 1 : vector<8x8xf32>, vector<8x8xf32> -> vector<8x16xf32>
    %108 = vector.extract_strided_slice %58 {offsets = [7, 0], sizes = [1, 16], strides = [1, 1]} : vector<10x16xf32> to vector<1x16xf32>
    %109 = vector.broadcast %108 : vector<1x16xf32> to vector<8x16xf32>
    %110 = arith.mulf %109, %107 : vector<8x16xf32>
    %111 = arith.addf %105, %110 : vector<8x16xf32>
    %c10_41 = arith.constant 10 : index
    %c0_42 = arith.constant 0 : index
    %112 = vector.load %arg21[%c10_41, %c0_42] : memref<18x16xf32, #tpu.memory_space<vmem>>, vector<8x16xf32>
    %113 = vector.extract_strided_slice %112 {offsets = [0, 0], sizes = [8, 8], strides = [1, 1]} : vector<8x16xf32> to vector<8x8xf32>
    %114 = tpu.concatenate %113, %113 in 1 : vector<8x8xf32>, vector<8x8xf32> -> vector<8x16xf32>
    %115 = vector.extract_strided_slice %58 {offsets = [8, 0], sizes = [1, 16], strides = [1, 1]} : vector<10x16xf32> to vector<1x16xf32>
    %116 = vector.broadcast %115 : vector<1x16xf32> to vector<8x16xf32>
    %117 = arith.mulf %116, %114 : vector<8x16xf32>
    %118 = arith.addf %111, %117 : vector<8x16xf32>
    %119 = vector.extract_strided_slice %112 {offsets = [0, 8], sizes = [8, 8], strides = [1, 1]} : vector<8x16xf32> to vector<8x8xf32>
    %120 = tpu.concatenate %119, %119 in 1 : vector<8x8xf32>, vector<8x8xf32> -> vector<8x16xf32>
    %121 = vector.extract_strided_slice %58 {offsets = [9, 0], sizes = [1, 16], strides = [1, 1]} : vector<10x16xf32> to vector<1x16xf32>
    %122 = vector.broadcast %121 : vector<1x16xf32> to vector<8x16xf32>
    %123 = arith.mulf %122, %120 : vector<8x16xf32>
    %124 = arith.addf %118, %123 : vector<8x16xf32>
    %125 = vector.extract_strided_slice %57 {offsets = [0, 0], sizes = [1, 16], strides = [1, 1]} : vector<7x16xf32> to vector<1x16xf32>
    %126 = vector.broadcast %125 : vector<1x16xf32> to vector<8x16xf32>
    %127 = arith.addf %124, %126 : vector<8x16xf32>
    %cst_43 = arith.constant 0.000000e+00 : f32
    %128 = vector.broadcast %cst_43 : f32 to vector<8x16xf32>
    %129 = arith.maximumf %127, %128 : vector<8x16xf32>
    %130 = arith.addf %129, %53 : vector<8x16xf32>
    %131 = vector.extract_strided_slice %57 {offsets = [1, 0], sizes = [1, 16], strides = [1, 1]} : vector<7x16xf32> to vector<1x16xf32>
    %132 = vector.extract_strided_slice %57 {offsets = [2, 0], sizes = [1, 16], strides = [1, 1]} : vector<7x16xf32> to vector<1x16xf32>
    %cst_44 = arith.constant dense<0.000000e+00> : vector<16xf32>
    %133 = vector.multi_reduction <add>, %130, %cst_44 [0] : vector<8x16xf32> to vector<16xf32>
    %134 = vector.shape_cast %133 : vector<16xf32> to vector<1x16xf32>
    %cst_45 = arith.constant 8.000000e+00 : f32
    %135 = vector.broadcast %cst_45 : f32 to vector<1x16xf32>
    %136 = arith.divf %134, %135 : vector<1x16xf32>
    %137 = vector.broadcast %136 : vector<1x16xf32> to vector<8x16xf32>
    %138 = arith.subf %130, %137 : vector<8x16xf32>
    %139 = arith.mulf %138, %138 : vector<8x16xf32>
    %cst_46 = arith.constant dense<0.000000e+00> : vector<16xf32>
    %140 = vector.multi_reduction <add>, %139, %cst_46 [0] : vector<8x16xf32> to vector<16xf32>
    %141 = vector.shape_cast %140 : vector<16xf32> to vector<1x16xf32>
    %cst_47 = arith.constant 8.000000e+00 : f32
    %142 = vector.broadcast %cst_47 : f32 to vector<1x16xf32>
    %143 = arith.divf %141, %142 : vector<1x16xf32>
    %144 = vector.broadcast %136 : vector<1x16xf32> to vector<8x16xf32>
    %145 = arith.subf %130, %144 : vector<8x16xf32>
    %cst_48 = arith.constant 9.99999974E-6 : f32
    %146 = vector.broadcast %cst_48 : f32 to vector<1x16xf32>
    %147 = arith.addf %143, %146 : vector<1x16xf32>
    %148 = math.rsqrt %147 : vector<1x16xf32>
    %149 = vector.broadcast %148 : vector<1x16xf32> to vector<8x16xf32>
    %150 = arith.mulf %145, %149 : vector<8x16xf32>
    %151 = vector.broadcast %131 : vector<1x16xf32> to vector<8x16xf32>
    %152 = arith.mulf %150, %151 : vector<8x16xf32>
    %153 = vector.broadcast %132 : vector<1x16xf32> to vector<8x16xf32>
    %154 = arith.addf %152, %153 : vector<8x16xf32>
    %155 = arith.truncf %154 : vector<8x16xf32> to vector<8x16xbf16>
    %c0_49 = arith.constant 0 : index
    %c0_50 = arith.constant 0 : index
    %156 = vector.load %arg7[%c0_49, %c0_50] : memref<16x16xbf16, #tpu.memory_space<vmem>>, vector<16x16xbf16>
    %cst_51 = arith.constant dense<0.000000e+00> : vector<8x16xf32>
    %157 = tpu.matmul %155, %156, %cst_51 {dimension_numbers = #tpu.dot_dimension_numbers<[1], [0], [0], [1], [0, 0, 1, 1], [], []>} : vector<8x16xbf16>, vector<16x16xbf16>, vector<8x16xf32> -> vector<8x16xf32>
    %158 = vector.extract_strided_slice %57 {offsets = [3, 0], sizes = [1, 16], strides = [1, 1]} : vector<7x16xf32> to vector<1x16xf32>
    %159 = vector.broadcast %158 : vector<1x16xf32> to vector<8x16xf32>
    %160 = arith.addf %157, %159 : vector<8x16xf32>
    %cst_52 = arith.constant 0.000000e+00 : f32
    %161 = vector.broadcast %cst_52 : f32 to vector<8x16xf32>
    %162 = arith.maximumf %160, %161 : vector<8x16xf32>
    %163 = arith.truncf %162 : vector<8x16xf32> to vector<8x16xbf16>
    %c0_53 = arith.constant 0 : index
    %c0_54 = arith.constant 0 : index
    %164 = vector.load %arg8[%c0_53, %c0_54] : memref<16x16xbf16, #tpu.memory_space<vmem>>, vector<16x16xbf16>
    %cst_55 = arith.constant dense<0.000000e+00> : vector<8x16xf32>
    %165 = tpu.matmul %163, %164, %cst_55 {dimension_numbers = #tpu.dot_dimension_numbers<[1], [0], [0], [1], [0, 0, 1, 1], [], []>} : vector<8x16xbf16>, vector<16x16xbf16>, vector<8x16xf32> -> vector<8x16xf32>
    %166 = vector.extract_strided_slice %57 {offsets = [4, 0], sizes = [1, 16], strides = [1, 1]} : vector<7x16xf32> to vector<1x16xf32>
    %167 = vector.broadcast %166 : vector<1x16xf32> to vector<8x16xf32>
    %168 = arith.addf %165, %167 : vector<8x16xf32>
    %169 = arith.addf %168, %154 : vector<8x16xf32>
    %170 = vector.extract_strided_slice %57 {offsets = [5, 0], sizes = [1, 16], strides = [1, 1]} : vector<7x16xf32> to vector<1x16xf32>
    %171 = vector.extract_strided_slice %57 {offsets = [6, 0], sizes = [1, 16], strides = [1, 1]} : vector<7x16xf32> to vector<1x16xf32>
    %cst_56 = arith.constant dense<0.000000e+00> : vector<16xf32>
    %172 = vector.multi_reduction <add>, %169, %cst_56 [0] : vector<8x16xf32> to vector<16xf32>
    %173 = vector.shape_cast %172 : vector<16xf32> to vector<1x16xf32>
    %cst_57 = arith.constant 8.000000e+00 : f32
    %174 = vector.broadcast %cst_57 : f32 to vector<1x16xf32>
    %175 = arith.divf %173, %174 : vector<1x16xf32>
    %176 = vector.broadcast %175 : vector<1x16xf32> to vector<8x16xf32>
    %177 = arith.subf %169, %176 : vector<8x16xf32>
    %178 = arith.mulf %177, %177 : vector<8x16xf32>
    %cst_58 = arith.constant dense<0.000000e+00> : vector<16xf32>
    %179 = vector.multi_reduction <add>, %178, %cst_58 [0] : vector<8x16xf32> to vector<16xf32>
    %180 = vector.shape_cast %179 : vector<16xf32> to vector<1x16xf32>
    %cst_59 = arith.constant 8.000000e+00 : f32
    %181 = vector.broadcast %cst_59 : f32 to vector<1x16xf32>
    %182 = arith.divf %180, %181 : vector<1x16xf32>
    %183 = vector.broadcast %175 : vector<1x16xf32> to vector<8x16xf32>
    %184 = arith.subf %169, %183 : vector<8x16xf32>
    %cst_60 = arith.constant 9.99999974E-6 : f32
    %185 = vector.broadcast %cst_60 : f32 to vector<1x16xf32>
    %186 = arith.addf %182, %185 : vector<1x16xf32>
    %187 = math.rsqrt %186 : vector<1x16xf32>
    %188 = vector.broadcast %187 : vector<1x16xf32> to vector<8x16xf32>
    %189 = arith.mulf %184, %188 : vector<8x16xf32>
    %190 = vector.broadcast %170 : vector<1x16xf32> to vector<8x16xf32>
    %191 = arith.mulf %189, %190 : vector<8x16xf32>
    %192 = vector.broadcast %171 : vector<1x16xf32> to vector<8x16xf32>
    %193 = arith.addf %191, %192 : vector<8x16xf32>
    %cst_61 = arith.constant 0.000000e+00 : f32
    %194 = vector.broadcast %cst_61 : f32 to vector<18x16xf32>
    %c0_62 = arith.constant 0 : index
    %c0_63 = arith.constant 0 : index
    %195 = vector.load %arg22[%c0_62, %c0_63] : memref<18x16xf32, #tpu.memory_space<vmem>>, vector<18x16xf32>
    tpu.vector_store %arg22[%c0_62, %c0_63], %194 {strides = array<i32>} : memref<18x16xf32, #tpu.memory_space<vmem>>, vector<18x16xf32>,
    %c8_64 = arith.constant 8 : index
    %c0_65 = arith.constant 0 : index
    %196 = vector.load %arg22[%c8_64, %c0_65] : memref<18x16xf32, #tpu.memory_space<vmem>>, vector<8x16xf32>
    tpu.vector_store %arg22[%c8_64, %c0_65], %193 {strides = array<i32>} : memref<18x16xf32, #tpu.memory_space<vmem>>, vector<8x16xf32>,
    %c6_66 = arith.constant 6 : index
    %c0_67 = arith.constant 0 : index
    %197 = vector.load %arg22[%c6_66, %c0_67] : memref<18x16xf32, #tpu.memory_space<vmem>>, vector<8x16xf32>
    %c7_68 = arith.constant 7 : index
    %c0_69 = arith.constant 0 : index
    %198 = vector.load %arg22[%c7_68, %c0_69] : memref<18x16xf32, #tpu.memory_space<vmem>>, vector<8x16xf32>
    %c8_70 = arith.constant 8 : index
    %c0_71 = arith.constant 0 : index
    %199 = vector.load %arg22[%c8_70, %c0_71] : memref<18x16xf32, #tpu.memory_space<vmem>>, vector<8x16xf32>
    %c9_72 = arith.constant 9 : index
    %c0_73 = arith.constant 0 : index
    %200 = vector.load %arg22[%c9_72, %c0_73] : memref<18x16xf32, #tpu.memory_space<vmem>>, vector<8x16xf32>
    %c10_74 = arith.constant 10 : index
    %c0_75 = arith.constant 0 : index
    %201 = vector.load %arg22[%c10_74, %c0_75] : memref<18x16xf32, #tpu.memory_space<vmem>>, vector<8x16xf32>
    %202 = tpu.concatenate %197, %198, %199, %200, %201 in 1 : vector<8x16xf32>, vector<8x16xf32>, vector<8x16xf32>, vector<8x16xf32>, vector<8x16xf32> -> vector<8x80xf32>
    %203 = arith.truncf %202 : vector<8x80xf32> to vector<8x80xbf16>
    %204 = tpu.iota {dimensions = array<i32: 0>} : vector<4x8xi32>
    %205 = tpu.iota {dimensions = array<i32: 1>} : vector<4x8xi32>
    %c2_i32_76 = arith.constant 2 : i32
    %206 = vector.broadcast %c2_i32_76 : i32 to vector<4x8xi32>
    %207 = arith.muli %206, %204 : vector<4x8xi32>
    %208 = arith.cmpi eq, %205, %207 : vector<4x8xi32>
    %209 = arith.extui %208 : vector<4x8xi1> to vector<4x8xi32>
    %210 = arith.sitofp %209 : vector<4x8xi32> to vector<4x8xf32>
    %211 = arith.truncf %210 : vector<4x8xf32> to vector<4x8xbf16>
    %cst_77 = arith.constant dense<0.000000e+00> : vector<4x80xf32>
    %212 = tpu.matmul %211, %203, %cst_77 {dimension_numbers = #tpu.dot_dimension_numbers<[1], [0], [0], [1], [0, 0, 1, 1], [], []>} : vector<4x8xbf16>, vector<8x80xbf16>, vector<4x80xf32> -> vector<4x80xf32>
    %213 = arith.truncf %212 : vector<4x80xf32> to vector<4x80xbf16>
    %c0_78 = arith.constant 0 : index
    %c0_79 = arith.constant 0 : index
    %214 = vector.load %arg9[%c0_78, %c0_79] : memref<80x32xbf16, #tpu.memory_space<vmem>>, vector<80x32xbf16>
    %cst_80 = arith.constant dense<0.000000e+00> : vector<4x32xf32>
    %215 = tpu.matmul %213, %214, %cst_80 {dimension_numbers = #tpu.dot_dimension_numbers<[1], [0], [0], [1], [0, 0, 1, 1], [], []>} : vector<4x80xbf16>, vector<80x32xbf16>, vector<4x32xf32> -> vector<4x32xf32>
    %c0_81 = arith.constant 0 : index
    %c0_82 = arith.constant 0 : index
    %216 = vector.load %arg10[%c0_81, %c0_82] : memref<3x32xf32, #tpu.memory_space<vmem>>, vector<3x32xf32>
    %217 = vector.extract_strided_slice %216 {offsets = [0, 0], sizes = [1, 32], strides = [1, 1]} : vector<3x32xf32> to vector<1x32xf32>
    %218 = vector.broadcast %217 : vector<1x32xf32> to vector<4x32xf32>
    %219 = arith.addf %215, %218 : vector<4x32xf32>
    %cst_83 = arith.constant 0.000000e+00 : f32
    %220 = vector.broadcast %cst_83 : f32 to vector<4x32xf32>
    %221 = arith.maximumf %219, %220 : vector<4x32xf32>
    %222 = vector.extract_strided_slice %216 {offsets = [1, 0], sizes = [1, 32], strides = [1, 1]} : vector<3x32xf32> to vector<1x32xf32>
    %223 = vector.extract_strided_slice %216 {offsets = [2, 0], sizes = [1, 32], strides = [1, 1]} : vector<3x32xf32> to vector<1x32xf32>
    %cst_84 = arith.constant dense<0.000000e+00> : vector<32xf32>
    %224 = vector.multi_reduction <add>, %221, %cst_84 [0] : vector<4x32xf32> to vector<32xf32>
    %225 = vector.shape_cast %224 : vector<32xf32> to vector<1x32xf32>
    %cst_85 = arith.constant 4.000000e+00 : f32
    %226 = vector.broadcast %cst_85 : f32 to vector<1x32xf32>
    %227 = arith.divf %225, %226 : vector<1x32xf32>
    %228 = vector.broadcast %227 : vector<1x32xf32> to vector<4x32xf32>
    %229 = arith.subf %221, %228 : vector<4x32xf32>
    %230 = arith.mulf %229, %229 : vector<4x32xf32>
    %cst_86 = arith.constant dense<0.000000e+00> : vector<32xf32>
    %231 = vector.multi_reduction <add>, %230, %cst_86 [0] : vector<4x32xf32> to vector<32xf32>
    %232 = vector.shape_cast %231 : vector<32xf32> to vector<1x32xf32>
    %cst_87 = arith.constant 4.000000e+00 : f32
    %233 = vector.broadcast %cst_87 : f32 to vector<1x32xf32>
    %234 = arith.divf %232, %233 : vector<1x32xf32>
    %235 = vector.broadcast %227 : vector<1x32xf32> to vector<4x32xf32>
    %236 = arith.subf %221, %235 : vector<4x32xf32>
    %cst_88 = arith.constant 9.99999974E-6 : f32
    %237 = vector.broadcast %cst_88 : f32 to vector<1x32xf32>
    %238 = arith.addf %234, %237 : vector<1x32xf32>
    %239 = math.rsqrt %238 : vector<1x32xf32>
    %240 = vector.broadcast %239 : vector<1x32xf32> to vector<4x32xf32>
    %241 = arith.mulf %236, %240 : vector<4x32xf32>
    %242 = vector.broadcast %222 : vector<1x32xf32> to vector<4x32xf32>
    %243 = arith.mulf %241, %242 : vector<4x32xf32>
    %244 = vector.broadcast %223 : vector<1x32xf32> to vector<4x32xf32>
    %245 = arith.addf %243, %244 : vector<4x32xf32>
    %cst_89 = arith.constant 0.000000e+00 : f32
    %246 = vector.broadcast %cst_89 : f32 to vector<14x32xf32>
    %c0_90 = arith.constant 0 : index
    %c0_91 = arith.constant 0 : index
    %247 = vector.load %arg23[%c0_90, %c0_91] : memref<14x32xf32, #tpu.memory_space<vmem>>, vector<14x32xf32>
    tpu.vector_store %arg23[%c0_90, %c0_91], %246 {strides = array<i32>} : memref<14x32xf32, #tpu.memory_space<vmem>>, vector<14x32xf32>,
    %c8_92 = arith.constant 8 : index
    %c0_93 = arith.constant 0 : index
    %248 = vector.load %arg23[%c8_92, %c0_93] : memref<14x32xf32, #tpu.memory_space<vmem>>, vector<4x32xf32>
    tpu.vector_store %arg23[%c8_92, %c0_93], %245 {strides = array<i32>} : memref<14x32xf32, #tpu.memory_space<vmem>>, vector<4x32xf32>,
    %c0_94 = arith.constant 0 : index
    %c0_95 = arith.constant 0 : index
    %249 = vector.load %arg12[%c0_94, %c0_95] : memref<7x32xf32, #tpu.memory_space<vmem>>, vector<7x32xf32>
    %c0_96 = arith.constant 0 : index
    %c0_97 = arith.constant 0 : index
    %250 = vector.load %arg11[%c0_96, %c0_97] : memref<20x32xf32, #tpu.memory_space<vmem>>, vector<20x32xf32>
    %cst_98 = arith.constant 0.000000e+00 : f32
    %251 = vector.broadcast %cst_98 : f32 to vector<4x32xf32>
    %c6_99 = arith.constant 6 : index
    %c0_100 = arith.constant 0 : index
    %252 = vector.load %arg23[%c6_99, %c0_100] : memref<14x32xf32, #tpu.memory_space<vmem>>, vector<4x32xf32>
    %253 = vector.extract_strided_slice %252 {offsets = [0, 0], sizes = [4, 8], strides = [1, 1]} : vector<4x32xf32> to vector<4x8xf32>
    %254 = tpu.concatenate %253, %253, %253, %253 in 1 : vector<4x8xf32>, vector<4x8xf32>, vector<4x8xf32>, vector<4x8xf32> -> vector<4x32xf32>
    %255 = vector.extract_strided_slice %250 {offsets = [0, 0], sizes = [1, 32], strides = [1, 1]} : vector<20x32xf32> to vector<1x32xf32>
    %256 = vector.broadcast %255 : vector<1x32xf32> to vector<4x32xf32>
    %257 = arith.mulf %256, %254 : vector<4x32xf32>
    %258 = arith.addf %251, %257 : vector<4x32xf32>
    %259 = vector.extract_strided_slice %252 {offsets = [0, 8], sizes = [4, 8], strides = [1, 1]} : vector<4x32xf32> to vector<4x8xf32>
    %260 = tpu.concatenate %259, %259, %259, %259 in 1 : vector<4x8xf32>, vector<4x8xf32>, vector<4x8xf32>, vector<4x8xf32> -> vector<4x32xf32>
    %261 = vector.extract_strided_slice %250 {offsets = [1, 0], sizes = [1, 32], strides = [1, 1]} : vector<20x32xf32> to vector<1x32xf32>
    %262 = vector.broadcast %261 : vector<1x32xf32> to vector<4x32xf32>
    %263 = arith.mulf %262, %260 : vector<4x32xf32>
    %264 = arith.addf %258, %263 : vector<4x32xf32>
    %265 = vector.extract_strided_slice %252 {offsets = [0, 16], sizes = [4, 8], strides = [1, 1]} : vector<4x32xf32> to vector<4x8xf32>
    %266 = tpu.concatenate %265, %265, %265, %265 in 1 : vector<4x8xf32>, vector<4x8xf32>, vector<4x8xf32>, vector<4x8xf32> -> vector<4x32xf32>
    %267 = vector.extract_strided_slice %250 {offsets = [2, 0], sizes = [1, 32], strides = [1, 1]} : vector<20x32xf32> to vector<1x32xf32>
    %268 = vector.broadcast %267 : vector<1x32xf32> to vector<4x32xf32>
    %269 = arith.mulf %268, %266 : vector<4x32xf32>
    %270 = arith.addf %264, %269 : vector<4x32xf32>
    %271 = vector.extract_strided_slice %252 {offsets = [0, 24], sizes = [4, 8], strides = [1, 1]} : vector<4x32xf32> to vector<4x8xf32>
    %272 = tpu.concatenate %271, %271, %271, %271 in 1 : vector<4x8xf32>, vector<4x8xf32>, vector<4x8xf32>, vector<4x8xf32> -> vector<4x32xf32>
    %273 = vector.extract_strided_slice %250 {offsets = [3, 0], sizes = [1, 32], strides = [1, 1]} : vector<20x32xf32> to vector<1x32xf32>
    %274 = vector.broadcast %273 : vector<1x32xf32> to vector<4x32xf32>
    %275 = arith.mulf %274, %272 : vector<4x32xf32>
    %276 = arith.addf %270, %275 : vector<4x32xf32>
    %c7_101 = arith.constant 7 : index
    %c0_102 = arith.constant 0 : index
    %277 = vector.load %arg23[%c7_101, %c0_102] : memref<14x32xf32, #tpu.memory_space<vmem>>, vector<4x32xf32>
    %278 = vector.extract_strided_slice %277 {offsets = [0, 0], sizes = [4, 8], strides = [1, 1]} : vector<4x32xf32> to vector<4x8xf32>
    %279 = tpu.concatenate %278, %278, %278, %278 in 1 : vector<4x8xf32>, vector<4x8xf32>, vector<4x8xf32>, vector<4x8xf32> -> vector<4x32xf32>
    %280 = vector.extract_strided_slice %250 {offsets = [4, 0], sizes = [1, 32], strides = [1, 1]} : vector<20x32xf32> to vector<1x32xf32>
    %281 = vector.broadcast %280 : vector<1x32xf32> to vector<4x32xf32>
    %282 = arith.mulf %281, %279 : vector<4x32xf32>
    %283 = arith.addf %276, %282 : vector<4x32xf32>
    %284 = vector.extract_strided_slice %277 {offsets = [0, 8], sizes = [4, 8], strides = [1, 1]} : vector<4x32xf32> to vector<4x8xf32>
    %285 = tpu.concatenate %284, %284, %284, %284 in 1 : vector<4x8xf32>, vector<4x8xf32>, vector<4x8xf32>, vector<4x8xf32> -> vector<4x32xf32>
    %286 = vector.extract_strided_slice %250 {offsets = [5, 0], sizes = [1, 32], strides = [1, 1]} : vector<20x32xf32> to vector<1x32xf32>
    %287 = vector.broadcast %286 : vector<1x32xf32> to vector<4x32xf32>
    %288 = arith.mulf %287, %285 : vector<4x32xf32>
    %289 = arith.addf %283, %288 : vector<4x32xf32>
    %290 = vector.extract_strided_slice %277 {offsets = [0, 16], sizes = [4, 8], strides = [1, 1]} : vector<4x32xf32> to vector<4x8xf32>
    %291 = tpu.concatenate %290, %290, %290, %290 in 1 : vector<4x8xf32>, vector<4x8xf32>, vector<4x8xf32>, vector<4x8xf32> -> vector<4x32xf32>
    %292 = vector.extract_strided_slice %250 {offsets = [6, 0], sizes = [1, 32], strides = [1, 1]} : vector<20x32xf32> to vector<1x32xf32>
    %293 = vector.broadcast %292 : vector<1x32xf32> to vector<4x32xf32>
    %294 = arith.mulf %293, %291 : vector<4x32xf32>
    %295 = arith.addf %289, %294 : vector<4x32xf32>
    %296 = vector.extract_strided_slice %277 {offsets = [0, 24], sizes = [4, 8], strides = [1, 1]} : vector<4x32xf32> to vector<4x8xf32>
    %297 = tpu.concatenate %296, %296, %296, %296 in 1 : vector<4x8xf32>, vector<4x8xf32>, vector<4x8xf32>, vector<4x8xf32> -> vector<4x32xf32>
    %298 = vector.extract_strided_slice %250 {offsets = [7, 0], sizes = [1, 32], strides = [1, 1]} : vector<20x32xf32> to vector<1x32xf32>
    %299 = vector.broadcast %298 : vector<1x32xf32> to vector<4x32xf32>
    %300 = arith.mulf %299, %297 : vector<4x32xf32>
    %301 = arith.addf %295, %300 : vector<4x32xf32>
    %c8_103 = arith.constant 8 : index
    %c0_104 = arith.constant 0 : index
    %302 = vector.load %arg23[%c8_103, %c0_104] : memref<14x32xf32, #tpu.memory_space<vmem>>, vector<4x32xf32>
    %303 = vector.extract_strided_slice %302 {offsets = [0, 0], sizes = [4, 8], strides = [1, 1]} : vector<4x32xf32> to vector<4x8xf32>
    %304 = tpu.concatenate %303, %303, %303, %303 in 1 : vector<4x8xf32>, vector<4x8xf32>, vector<4x8xf32>, vector<4x8xf32> -> vector<4x32xf32>
    %305 = vector.extract_strided_slice %250 {offsets = [8, 0], sizes = [1, 32], strides = [1, 1]} : vector<20x32xf32> to vector<1x32xf32>
    %306 = vector.broadcast %305 : vector<1x32xf32> to vector<4x32xf32>
    %307 = arith.mulf %306, %304 : vector<4x32xf32>
    %308 = arith.addf %301, %307 : vector<4x32xf32>
    %309 = vector.extract_strided_slice %302 {offsets = [0, 8], sizes = [4, 8], strides = [1, 1]} : vector<4x32xf32> to vector<4x8xf32>
    %310 = tpu.concatenate %309, %309, %309, %309 in 1 : vector<4x8xf32>, vector<4x8xf32>, vector<4x8xf32>, vector<4x8xf32> -> vector<4x32xf32>
    %311 = vector.extract_strided_slice %250 {offsets = [9, 0], sizes = [1, 32], strides = [1, 1]} : vector<20x32xf32> to vector<1x32xf32>
    %312 = vector.broadcast %311 : vector<1x32xf32> to vector<4x32xf32>
    %313 = arith.mulf %312, %310 : vector<4x32xf32>
    %314 = arith.addf %308, %313 : vector<4x32xf32>
    %315 = vector.extract_strided_slice %302 {offsets = [0, 16], sizes = [4, 8], strides = [1, 1]} : vector<4x32xf32> to vector<4x8xf32>
    %316 = tpu.concatenate %315, %315, %315, %315 in 1 : vector<4x8xf32>, vector<4x8xf32>, vector<4x8xf32>, vector<4x8xf32> -> vector<4x32xf32>
    %317 = vector.extract_strided_slice %250 {offsets = [10, 0], sizes = [1, 32], strides = [1, 1]} : vector<20x32xf32> to vector<1x32xf32>
    %318 = vector.broadcast %317 : vector<1x32xf32> to vector<4x32xf32>
    %319 = arith.mulf %318, %316 : vector<4x32xf32>
    %320 = arith.addf %314, %319 : vector<4x32xf32>
    %321 = vector.extract_strided_slice %302 {offsets = [0, 24], sizes = [4, 8], strides = [1, 1]} : vector<4x32xf32> to vector<4x8xf32>
    %322 = tpu.concatenate %321, %321, %321, %321 in 1 : vector<4x8xf32>, vector<4x8xf32>, vector<4x8xf32>, vector<4x8xf32> -> vector<4x32xf32>
    %323 = vector.extract_strided_slice %250 {offsets = [11, 0], sizes = [1, 32], strides = [1, 1]} : vector<20x32xf32> to vector<1x32xf32>
    %324 = vector.broadcast %323 : vector<1x32xf32> to vector<4x32xf32>
    %325 = arith.mulf %324, %322 : vector<4x32xf32>
    %326 = arith.addf %320, %325 : vector<4x32xf32>
    %c9_105 = arith.constant 9 : index
    %c0_106 = arith.constant 0 : index
    %327 = vector.load %arg23[%c9_105, %c0_106] : memref<14x32xf32, #tpu.memory_space<vmem>>, vector<4x32xf32>
    %328 = vector.extract_strided_slice %327 {offsets = [0, 0], sizes = [4, 8], strides = [1, 1]} : vector<4x32xf32> to vector<4x8xf32>
    %329 = tpu.concatenate %328, %328, %328, %328 in 1 : vector<4x8xf32>, vector<4x8xf32>, vector<4x8xf32>, vector<4x8xf32> -> vector<4x32xf32>
    %330 = vector.extract_strided_slice %250 {offsets = [12, 0], sizes = [1, 32], strides = [1, 1]} : vector<20x32xf32> to vector<1x32xf32>
    %331 = vector.broadcast %330 : vector<1x32xf32> to vector<4x32xf32>
    %332 = arith.mulf %331, %329 : vector<4x32xf32>
    %333 = arith.addf %326, %332 : vector<4x32xf32>
    %334 = vector.extract_strided_slice %327 {offsets = [0, 8], sizes = [4, 8], strides = [1, 1]} : vector<4x32xf32> to vector<4x8xf32>
    %335 = tpu.concatenate %334, %334, %334, %334 in 1 : vector<4x8xf32>, vector<4x8xf32>, vector<4x8xf32>, vector<4x8xf32> -> vector<4x32xf32>
    %336 = vector.extract_strided_slice %250 {offsets = [13, 0], sizes = [1, 32], strides = [1, 1]} : vector<20x32xf32> to vector<1x32xf32>
    %337 = vector.broadcast %336 : vector<1x32xf32> to vector<4x32xf32>
    %338 = arith.mulf %337, %335 : vector<4x32xf32>
    %339 = arith.addf %333, %338 : vector<4x32xf32>
    %340 = vector.extract_strided_slice %327 {offsets = [0, 16], sizes = [4, 8], strides = [1, 1]} : vector<4x32xf32> to vector<4x8xf32>
    %341 = tpu.concatenate %340, %340, %340, %340 in 1 : vector<4x8xf32>, vector<4x8xf32>, vector<4x8xf32>, vector<4x8xf32> -> vector<4x32xf32>
    %342 = vector.extract_strided_slice %250 {offsets = [14, 0], sizes = [1, 32], strides = [1, 1]} : vector<20x32xf32> to vector<1x32xf32>
    %343 = vector.broadcast %342 : vector<1x32xf32> to vector<4x32xf32>
    %344 = arith.mulf %343, %341 : vector<4x32xf32>
    %345 = arith.addf %339, %344 : vector<4x32xf32>
    %346 = vector.extract_strided_slice %327 {offsets = [0, 24], sizes = [4, 8], strides = [1, 1]} : vector<4x32xf32> to vector<4x8xf32>
    %347 = tpu.concatenate %346, %346, %346, %346 in 1 : vector<4x8xf32>, vector<4x8xf32>, vector<4x8xf32>, vector<4x8xf32> -> vector<4x32xf32>
    %348 = vector.extract_strided_slice %250 {offsets = [15, 0], sizes = [1, 32], strides = [1, 1]} : vector<20x32xf32> to vector<1x32xf32>
    %349 = vector.broadcast %348 : vector<1x32xf32> to vector<4x32xf32>
    %350 = arith.mulf %349, %347 : vector<4x32xf32>
    %351 = arith.addf %345, %350 : vector<4x32xf32>
    %c10_107 = arith.constant 10 : index
    %c0_108 = arith.constant 0 : index
    %352 = vector.load %arg23[%c10_107, %c0_108] : memref<14x32xf32, #tpu.memory_space<vmem>>, vector<4x32xf32>
    %353 = vector.extract_strided_slice %352 {offsets = [0, 0], sizes = [4, 8], strides = [1, 1]} : vector<4x32xf32> to vector<4x8xf32>
    %354 = tpu.concatenate %353, %353, %353, %353 in 1 : vector<4x8xf32>, vector<4x8xf32>, vector<4x8xf32>, vector<4x8xf32> -> vector<4x32xf32>
    %355 = vector.extract_strided_slice %250 {offsets = [16, 0], sizes = [1, 32], strides = [1, 1]} : vector<20x32xf32> to vector<1x32xf32>
    %356 = vector.broadcast %355 : vector<1x32xf32> to vector<4x32xf32>
    %357 = arith.mulf %356, %354 : vector<4x32xf32>
    %358 = arith.addf %351, %357 : vector<4x32xf32>
    %359 = vector.extract_strided_slice %352 {offsets = [0, 8], sizes = [4, 8], strides = [1, 1]} : vector<4x32xf32> to vector<4x8xf32>
    %360 = tpu.concatenate %359, %359, %359, %359 in 1 : vector<4x8xf32>, vector<4x8xf32>, vector<4x8xf32>, vector<4x8xf32> -> vector<4x32xf32>
    %361 = vector.extract_strided_slice %250 {offsets = [17, 0], sizes = [1, 32], strides = [1, 1]} : vector<20x32xf32> to vector<1x32xf32>
    %362 = vector.broadcast %361 : vector<1x32xf32> to vector<4x32xf32>
    %363 = arith.mulf %362, %360 : vector<4x32xf32>
    %364 = arith.addf %358, %363 : vector<4x32xf32>
    %365 = vector.extract_strided_slice %352 {offsets = [0, 16], sizes = [4, 8], strides = [1, 1]} : vector<4x32xf32> to vector<4x8xf32>
    %366 = tpu.concatenate %365, %365, %365, %365 in 1 : vector<4x8xf32>, vector<4x8xf32>, vector<4x8xf32>, vector<4x8xf32> -> vector<4x32xf32>
    %367 = vector.extract_strided_slice %250 {offsets = [18, 0], sizes = [1, 32], strides = [1, 1]} : vector<20x32xf32> to vector<1x32xf32>
    %368 = vector.broadcast %367 : vector<1x32xf32> to vector<4x32xf32>
    %369 = arith.mulf %368, %366 : vector<4x32xf32>
    %370 = arith.addf %364, %369 : vector<4x32xf32>
    %371 = vector.extract_strided_slice %352 {offsets = [0, 24], sizes = [4, 8], strides = [1, 1]} : vector<4x32xf32> to vector<4x8xf32>
    %372 = tpu.concatenate %371, %371, %371, %371 in 1 : vector<4x8xf32>, vector<4x8xf32>, vector<4x8xf32>, vector<4x8xf32> -> vector<4x32xf32>
    %373 = vector.extract_strided_slice %250 {offsets = [19, 0], sizes = [1, 32], strides = [1, 1]} : vector<20x32xf32> to vector<1x32xf32>
    %374 = vector.broadcast %373 : vector<1x32xf32> to vector<4x32xf32>
    %375 = arith.mulf %374, %372 : vector<4x32xf32>
    %376 = arith.addf %370, %375 : vector<4x32xf32>
    %377 = vector.extract_strided_slice %249 {offsets = [0, 0], sizes = [1, 32], strides = [1, 1]} : vector<7x32xf32> to vector<1x32xf32>
    %378 = vector.broadcast %377 : vector<1x32xf32> to vector<4x32xf32>
    %379 = arith.addf %376, %378 : vector<4x32xf32>
    %cst_109 = arith.constant 0.000000e+00 : f32
    %380 = vector.broadcast %cst_109 : f32 to vector<4x32xf32>
    %381 = arith.maximumf %379, %380 : vector<4x32xf32>
    %382 = arith.addf %381, %245 : vector<4x32xf32>
    %383 = vector.extract_strided_slice %249 {offsets = [1, 0], sizes = [1, 32], strides = [1, 1]} : vector<7x32xf32> to vector<1x32xf32>
    %384 = vector.extract_strided_slice %249 {offsets = [2, 0], sizes = [1, 32], strides = [1, 1]} : vector<7x32xf32> to vector<1x32xf32>
    %cst_110 = arith.constant dense<0.000000e+00> : vector<32xf32>
    %385 = vector.multi_reduction <add>, %382, %cst_110 [0] : vector<4x32xf32> to vector<32xf32>
    %386 = vector.shape_cast %385 : vector<32xf32> to vector<1x32xf32>
    %cst_111 = arith.constant 4.000000e+00 : f32
    %387 = vector.broadcast %cst_111 : f32 to vector<1x32xf32>
    %388 = arith.divf %386, %387 : vector<1x32xf32>
    %389 = vector.broadcast %388 : vector<1x32xf32> to vector<4x32xf32>
    %390 = arith.subf %382, %389 : vector<4x32xf32>
    %391 = arith.mulf %390, %390 : vector<4x32xf32>
    %cst_112 = arith.constant dense<0.000000e+00> : vector<32xf32>
    %392 = vector.multi_reduction <add>, %391, %cst_112 [0] : vector<4x32xf32> to vector<32xf32>
    %393 = vector.shape_cast %392 : vector<32xf32> to vector<1x32xf32>
    %cst_113 = arith.constant 4.000000e+00 : f32
    %394 = vector.broadcast %cst_113 : f32 to vector<1x32xf32>
    %395 = arith.divf %393, %394 : vector<1x32xf32>
    %396 = vector.broadcast %388 : vector<1x32xf32> to vector<4x32xf32>
    %397 = arith.subf %382, %396 : vector<4x32xf32>
    %cst_114 = arith.constant 9.99999974E-6 : f32
    %398 = vector.broadcast %cst_114 : f32 to vector<1x32xf32>
    %399 = arith.addf %395, %398 : vector<1x32xf32>
    %400 = math.rsqrt %399 : vector<1x32xf32>
    %401 = vector.broadcast %400 : vector<1x32xf32> to vector<4x32xf32>
    %402 = arith.mulf %397, %401 : vector<4x32xf32>
    %403 = vector.broadcast %383 : vector<1x32xf32> to vector<4x32xf32>
    %404 = arith.mulf %402, %403 : vector<4x32xf32>
    %405 = vector.broadcast %384 : vector<1x32xf32> to vector<4x32xf32>
    %406 = arith.addf %404, %405 : vector<4x32xf32>
    %407 = arith.truncf %406 : vector<4x32xf32> to vector<4x32xbf16>
    %c0_115 = arith.constant 0 : index
    %c0_116 = arith.constant 0 : index
    %408 = vector.load %arg13[%c0_115, %c0_116] : memref<32x32xbf16, #tpu.memory_space<vmem>>, vector<32x32xbf16>
    %cst_117 = arith.constant dense<0.000000e+00> : vector<4x32xf32>
    %409 = tpu.matmul %407, %408, %cst_117 {dimension_numbers = #tpu.dot_dimension_numbers<[1], [0], [0], [1], [0, 0, 1, 1], [], []>} : vector<4x32xbf16>, vector<32x32xbf16>, vector<4x32xf32> -> vector<4x32xf32>
    %410 = vector.extract_strided_slice %249 {offsets = [3, 0], sizes = [1, 32], strides = [1, 1]} : vector<7x32xf32> to vector<1x32xf32>
    %411 = vector.broadcast %410 : vector<1x32xf32> to vector<4x32xf32>
    %412 = arith.addf %409, %411 : vector<4x32xf32>
    %cst_118 = arith.constant 0.000000e+00 : f32
    %413 = vector.broadcast %cst_118 : f32 to vector<4x32xf32>
    %414 = arith.maximumf %412, %413 : vector<4x32xf32>
    %415 = arith.truncf %414 : vector<4x32xf32> to vector<4x32xbf16>
    %c0_119 = arith.constant 0 : index
    %c0_120 = arith.constant 0 : index
    %416 = vector.load %arg14[%c0_119, %c0_120] : memref<32x32xbf16, #tpu.memory_space<vmem>>, vector<32x32xbf16>
    %cst_121 = arith.constant dense<0.000000e+00> : vector<4x32xf32>
    %417 = tpu.matmul %415, %416, %cst_121 {dimension_numbers = #tpu.dot_dimension_numbers<[1], [0], [0], [1], [0, 0, 1, 1], [], []>} : vector<4x32xbf16>, vector<32x32xbf16>, vector<4x32xf32> -> vector<4x32xf32>
    %418 = vector.extract_strided_slice %249 {offsets = [4, 0], sizes = [1, 32], strides = [1, 1]} : vector<7x32xf32> to vector<1x32xf32>
    %419 = vector.broadcast %418 : vector<1x32xf32> to vector<4x32xf32>
    %420 = arith.addf %417, %419 : vector<4x32xf32>
    %421 = arith.addf %420, %406 : vector<4x32xf32>
    %422 = vector.extract_strided_slice %249 {offsets = [5, 0], sizes = [1, 32], strides = [1, 1]} : vector<7x32xf32> to vector<1x32xf32>
    %423 = vector.extract_strided_slice %249 {offsets = [6, 0], sizes = [1, 32], strides = [1, 1]} : vector<7x32xf32> to vector<1x32xf32>
    %cst_122 = arith.constant dense<0.000000e+00> : vector<32xf32>
    %424 = vector.multi_reduction <add>, %421, %cst_122 [0] : vector<4x32xf32> to vector<32xf32>
    %425 = vector.shape_cast %424 : vector<32xf32> to vector<1x32xf32>
    %cst_123 = arith.constant 4.000000e+00 : f32
    %426 = vector.broadcast %cst_123 : f32 to vector<1x32xf32>
    %427 = arith.divf %425, %426 : vector<1x32xf32>
    %428 = vector.broadcast %427 : vector<1x32xf32> to vector<4x32xf32>
    %429 = arith.subf %421, %428 : vector<4x32xf32>
    %430 = arith.mulf %429, %429 : vector<4x32xf32>
    %cst_124 = arith.constant dense<0.000000e+00> : vector<32xf32>
    %431 = vector.multi_reduction <add>, %430, %cst_124 [0] : vector<4x32xf32> to vector<32xf32>
    %432 = vector.shape_cast %431 : vector<32xf32> to vector<1x32xf32>
    %cst_125 = arith.constant 4.000000e+00 : f32
    %433 = vector.broadcast %cst_125 : f32 to vector<1x32xf32>
    %434 = arith.divf %432, %433 : vector<1x32xf32>
    %435 = vector.broadcast %427 : vector<1x32xf32> to vector<4x32xf32>
    %436 = arith.subf %421, %435 : vector<4x32xf32>
    %cst_126 = arith.constant 9.99999974E-6 : f32
    %437 = vector.broadcast %cst_126 : f32 to vector<1x32xf32>
    %438 = arith.addf %434, %437 : vector<1x32xf32>
    %439 = math.rsqrt %438 : vector<1x32xf32>
    %440 = vector.broadcast %439 : vector<1x32xf32> to vector<4x32xf32>
    %441 = arith.mulf %436, %440 : vector<4x32xf32>
    %442 = vector.broadcast %422 : vector<1x32xf32> to vector<4x32xf32>
    %443 = arith.mulf %441, %442 : vector<4x32xf32>
    %444 = vector.broadcast %423 : vector<1x32xf32> to vector<4x32xf32>
    %445 = arith.addf %443, %444 : vector<4x32xf32>
    %c0_127 = arith.constant 0 : index
    %c0_128 = arith.constant 0 : index
    %c0_129 = arith.constant 0 : index
    %446 = vector.load %arg2[%c0_127, %c0_128, %c0_129] : memref<1x4x8xf32, #tpu.memory_space<vmem>>, vector<1x4x8xf32>
    %447 = vector.shape_cast %446 : vector<1x4x8xf32> to vector<4x8xf32>
    %448 = arith.truncf %445 : vector<4x32xf32> to vector<4x32xbf16>
    %c0_130 = arith.constant 0 : index
    %c0_131 = arith.constant 0 : index
    %449 = vector.load %arg15[%c0_130, %c0_131] : memref<32x8xbf16, #tpu.memory_space<vmem>>, vector<32x8xbf16>
    %cst_132 = arith.constant dense<0.000000e+00> : vector<4x8xf32>
    %450 = tpu.matmul %448, %449, %cst_132 {dimension_numbers = #tpu.dot_dimension_numbers<[1], [0], [0], [1], [0, 0, 1, 1], [], []>} : vector<4x32xbf16>, vector<32x8xbf16>, vector<4x8xf32> -> vector<4x8xf32>
    %c0_133 = arith.constant 0 : index
    %c0_134 = arith.constant 0 : index
    %451 = vector.load %arg16[%c0_133, %c0_134] : memref<1x8xf32, #tpu.memory_space<vmem>>, vector<1x8xf32>
    %452 = vector.broadcast %451 : vector<1x8xf32> to vector<4x8xf32>
    %453 = arith.addf %450, %452 : vector<4x8xf32>
    %454 = arith.addf %453, %447 : vector<4x8xf32>
    %cst_135 = arith.constant 1.000000e+00 : f32
    %455 = vector.broadcast %cst_135 : f32 to vector<4x8xf32>
    %456 = arith.mulf %454, %455 : vector<4x8xf32>
    %cst_136 = arith.constant dense<0xFF800000> : vector<4xf32>
    %457 = vector.multi_reduction <maximumf>, %456, %cst_136 [1] : vector<4x8xf32> to vector<4xf32>
    %458 = vector.shape_cast %457 : vector<4xf32> to vector<4x1xf32>
    %459 = vector.broadcast %458 : vector<4x1xf32> to vector<4x8xf32>
    %460 = arith.subf %456, %459 : vector<4x8xf32>
    %461 = math.exp %460 : vector<4x8xf32>
    %cst_137 = arith.constant dense<0.000000e+00> : vector<4xf32>
    %462 = vector.multi_reduction <add>, %461, %cst_137 [1] : vector<4x8xf32> to vector<4xf32>
    %463 = vector.shape_cast %462 : vector<4xf32> to vector<4x1xf32>
    %464 = tpu.reciprocal %463 {approx = true} : vector<4x1xf32> -> vector<4x1xf32>
    %465 = vector.broadcast %464 : vector<4x1xf32> to vector<4x8xf32>
    %466 = arith.mulf %461, %465 : vector<4x8xf32>
    %467 = arith.truncf %466 : vector<4x8xf32> to vector<4x8xbf16>
    %c0_138 = arith.constant 0 : index
    %c0_139 = arith.constant 0 : index
    %468 = vector.load %arg17[%c0_138, %c0_139] : memref<8x16xbf16, #tpu.memory_space<vmem>>, vector<8x16xbf16>
    %cst_140 = arith.constant dense<0.000000e+00> : vector<4x16xf32>
    %469 = tpu.matmul %467, %468, %cst_140 {dimension_numbers = #tpu.dot_dimension_numbers<[1], [0], [0], [1], [0, 0, 1, 1], [], []>} : vector<4x8xbf16>, vector<8x16xbf16>, vector<4x16xf32> -> vector<4x16xf32>
    %c0_141 = arith.constant 0 : index
    %c0_142 = arith.constant 0 : index
    %470 = vector.load %arg18[%c0_141, %c0_142] : memref<1x16xf32, #tpu.memory_space<vmem>>, vector<1x16xf32>
    %471 = vector.broadcast %470 : vector<1x16xf32> to vector<4x16xf32>
    %472 = arith.addf %469, %471 : vector<4x16xf32>
    %cst_143 = arith.constant 0.000000e+00 : f32
    %473 = vector.broadcast %cst_143 : f32 to vector<4x104xf32>
    %474 = tpu.concatenate %453, %472, %473 in 1 : vector<4x8xf32>, vector<4x16xf32>, vector<4x104xf32> -> vector<4x128xf32>
    %c0_144 = arith.constant 0 : index
    %c0_145 = arith.constant 0 : index
    %c0_146 = arith.constant 0 : index
    %475 = vector.load %arg19[%c0_144, %c0_145, %c0_146] : memref<1x4x128xf32, #tpu.memory_space<vmem>>, vector<1x4x128xf32>
    %476 = vector.shape_cast %475 : vector<1x4x128xf32> to vector<4x128xf32>
    %477 = vector.shape_cast %474 : vector<4x128xf32> to vector<1x4x128xf32>
    tpu.vector_store %arg19[%c0_144, %c0_145, %c0_146], %477 {strides = array<i32>} : memref<1x4x128xf32, #tpu.memory_space<vmem>>, vector<1x4x128xf32>,
    return
  }
  func.func @transform_0(%arg0: i32) -> (i32, i32, i32) {
    %c0_i32 = arith.constant 0 : i32
    %c0_i32_0 = arith.constant 0 : i32
    %c0_i32_1 = arith.constant 0 : i32
    return %arg0, %c0_i32, %c0_i32_0 : i32, i32, i32
  }
  func.func @transform_1(%arg0: i32) -> (i32, i32, i32) {
    %c0_i32 = arith.constant 0 : i32
    %c0_i32_0 = arith.constant 0 : i32
    %c0_i32_1 = arith.constant 0 : i32
    return %arg0, %c0_i32, %c0_i32_0 : i32, i32, i32
  }
  func.func @transform_2(%arg0: i32) -> (i32, i32) {
    %c0_i32 = arith.constant 0 : i32
    %c0_i32_0 = arith.constant 0 : i32
    %c0_i32_1 = arith.constant 0 : i32
    return %c0_i32, %c0_i32_0 : i32, i32
  }
  func.func @transform_3(%arg0: i32) -> (i32, i32) {
    %c0_i32 = arith.constant 0 : i32
    %c0_i32_0 = arith.constant 0 : i32
    %c0_i32_1 = arith.constant 0 : i32
    return %c0_i32, %c0_i32_0 : i32, i32
  }
  func.func @transform_4(%arg0: i32) -> (i32, i32) {
    %c0_i32 = arith.constant 0 : i32
    %c0_i32_0 = arith.constant 0 : i32
    %c0_i32_1 = arith.constant 0 : i32
    return %c0_i32, %c0_i32_0 : i32, i32
  }
  func.func @transform_5(%arg0: i32) -> (i32, i32) {
    %c0_i32 = arith.constant 0 : i32
    %c0_i32_0 = arith.constant 0 : i32
    %c0_i32_1 = arith.constant 0 : i32
    return %c0_i32, %c0_i32_0 : i32, i32
  }
  func.func @transform_6(%arg0: i32) -> (i32, i32) {
    %c0_i32 = arith.constant 0 : i32
    %c0_i32_0 = arith.constant 0 : i32
    %c0_i32_1 = arith.constant 0 : i32
    return %c0_i32, %c0_i32_0 : i32, i32
  }
  func.func @transform_7(%arg0: i32) -> (i32, i32) {
    %c0_i32 = arith.constant 0 : i32
    %c0_i32_0 = arith.constant 0 : i32
    %c0_i32_1 = arith.constant 0 : i32
    return %c0_i32, %c0_i32_0 : i32, i32
  }
  func.func @transform_8(%arg0: i32) -> (i32, i32) {
    %c0_i32 = arith.constant 0 : i32
    %c0_i32_0 = arith.constant 0 : i32
    %c0_i32_1 = arith.constant 0 : i32
    return %c0_i32, %c0_i32_0 : i32, i32
  }
  func.func @transform_9(%arg0: i32) -> (i32, i32) {
    %c0_i32 = arith.constant 0 : i32
    %c0_i32_0 = arith.constant 0 : i32
    %c0_i32_1 = arith.constant 0 : i32
    return %c0_i32, %c0_i32_0 : i32, i32
  }
  func.func @transform_10(%arg0: i32) -> (i32, i32) {
    %c0_i32 = arith.constant 0 : i32
    %c0_i32_0 = arith.constant 0 : i32
    %c0_i32_1 = arith.constant 0 : i32
    return %c0_i32, %c0_i32_0 : i32, i32
  }
  func.func @transform_11(%arg0: i32) -> (i32, i32) {
    %c0_i32 = arith.constant 0 : i32
    %c0_i32_0 = arith.constant 0 : i32
    %c0_i32_1 = arith.constant 0 : i32
    return %c0_i32, %c0_i32_0 : i32, i32
  }
  func.func @transform_12(%arg0: i32) -> (i32, i32) {
    %c0_i32 = arith.constant 0 : i32
    %c0_i32_0 = arith.constant 0 : i32
    %c0_i32_1 = arith.constant 0 : i32
    return %c0_i32, %c0_i32_0 : i32, i32
  }
  func.func @transform_13(%arg0: i32) -> (i32, i32) {
    %c0_i32 = arith.constant 0 : i32
    %c0_i32_0 = arith.constant 0 : i32
    %c0_i32_1 = arith.constant 0 : i32
    return %c0_i32, %c0_i32_0 : i32, i32
  }
  func.func @transform_14(%arg0: i32) -> (i32, i32) {
    %c0_i32 = arith.constant 0 : i32
    %c0_i32_0 = arith.constant 0 : i32
    %c0_i32_1 = arith.constant 0 : i32
    return %c0_i32, %c0_i32_0 : i32, i32
  }
  func.func @transform_15(%arg0: i32) -> (i32, i32) {
    %c0_i32 = arith.constant 0 : i32
    %c0_i32_0 = arith.constant 0 : i32
    %c0_i32_1 = arith.constant 0 : i32
    return %c0_i32, %c0_i32_0 : i32, i32
  }
  func.func @transform_16(%arg0: i32) -> (i32, i32) {
    %c0_i32 = arith.constant 0 : i32
    %c0_i32_0 = arith.constant 0 : i32
    %c0_i32_1 = arith.constant 0 : i32
    return %c0_i32, %c0_i32_0 : i32, i32
  }
  func.func @transform_17(%arg0: i32) -> (i32, i32) {
    %c0_i32 = arith.constant 0 : i32
    %c0_i32_0 = arith.constant 0 : i32
    %c0_i32_1 = arith.constant 0 : i32
    return %c0_i32, %c0_i32_0 : i32, i32
  }
  func.func @transform_18(%arg0: i32) -> (i32, i32, i32) {
    %c0_i32 = arith.constant 0 : i32
    %c0_i32_0 = arith.constant 0 : i32
    %c0_i32_1 = arith.constant 0 : i32
    return %arg0, %c0_i32, %c0_i32_0 : i32, i32, i32
  }
}

</mosaic_0001>

<bundles_post_ra>
// kernel: tpu_custom_call.1
= control target key start
LH: loop header
LB: loop body
LE: loop exit
PB: predicated region body
PF: predicated region fallthrough
CT: control target
= control target key end

     0   :  { %s2678_s0 = inlined_call_operand.vmem [shape: f32[2,16,8], index: 0, kind: input, shape index: {}]   ;;  %s2679_s1 = inlined_call_operand.vmem [shape: f32[2,4,8], index: 1, kind: input, shape index: {}]   ;;  %s2680_s2 = inlined_call_operand.vmem [shape: bf16[40,16], index: 2, kind: input, shape index: {}]   ;;  %s2681_s3 = inlined_call_operand.hbm [shape: f32[3,16], index: 3, kind: input, shape index: {}]   ;;  %s2682_s4 = inlined_call_operand.vmem [shape: f32[10,16], index: 4, kind: input, shape index: {}]   ;;  %s2683_s5 = inlined_call_operand.vmem [shape: f32[7,16], index: 5, kind: input, shape index: {}]   ;;  %s2684_s6 = inlined_call_operand.vmem [shape: bf16[16,16], index: 6, kind: input, shape index: {}]   ;;  %s2685_s7 = inlined_call_operand.vmem [shape: bf16[16,16], index: 7, kind: input, shape index: {}]   ;;  %s2686_s8 = inlined_call_operand.vmem [shape: bf16[80,32], index: 8, kind: input, shape index: {}]   ;;  %s2687_s9 = inlined_call_operand.hbm [shape: f32[3,32], index: 9, kind: input, shape index: {}]   ;;  %s2688_s10 = inlined_call_operand.vmem [shape: f32[20,32], index: 10, kind: input, shape index: {}]   ;;  %s2689_s11 = inlined_call_operand.vmem [shape: f32[7,32], index: 11, kind: input, shape index: {}]   ;;  %s2690_s12 = inlined_call_operand.vmem [shape: bf16[32,32], index: 12, kind: input, shape index: {}]   ;;  %s2691_s13 = inlined_call_operand.vmem [shape: bf16[32,32], index: 13, kind: input, shape index: {}]   ;;  %s2692_s14 = inlined_call_operand.vmem [shape: bf16[32,8], index: 14, kind: input, shape index: {}]   ;;  %s2693_s15 = inlined_call_operand.vmem [shape: f32[1,8], index: 15, kind: input, shape index: {}]   ;;  %s2694_s16 = inlined_call_operand.vmem [shape: bf16[8,16], index: 16, kind: input, shape index: {}]   ;;  %s2695_s17 = inlined_call_operand.vmem [shape: f32[1,16], index: 17, kind: input, shape index: {}]   ;;  %s2696_s18 = inlined_call_operand.hbm [shape: f32[2,4,128], index: 18, kind: output, shape index: {}]  }
   0x1   :  { %2710 = sst [smem:[#allocation20_spill]] %s2678_s0 }
   0x2   :  { %2711 = sst [smem:[#allocation21_spill]] %s2679_s1 }
   0x3   :  { %2712 = sst [smem:[#allocation22_spill]] %s2680_s2 }
   0x4   :  { %2713 = sst [smem:[#allocation23_spill]] %s2681_s3 }
   0x5   :  { %23 = vsyncpa [#allocation7], 0 }
   0x6   :  { %24 = vsyncpa [#allocation10], 0 }
   0x7   :  { %25 = vsyncpa [#allocation8], 0 }
   0x8   :  { %27 = vsyncpa [#allocation8 + $0x1], 0  ;;  %s2184_s27 = smov 0   ;;  %s2186_s28 = smov 0  }
   0x9   :  { %s2188_s29 = smov 0   ;;  %s2190_s30 = smov 0  }
   0xa LB: > { %2714 = sst [smem:[#allocation15_spill]] %s2061_s27  ;;  %s2205_s0 = sadd.s32 4294967295, %s2073_s30   ;;  %s2073_s30 = sphi %s2190_s30, %s2731_s30   ;;  %s2069_s29 = sphi %s2188_s29, %s2733_s29   ;;  %s2065_s28 = sphi %s2186_s28, %s2735_s28   ;;  %s2061_s27 = sphi %s2184_s27, %s2734_s27  }
   0xb   : > { %2715 = sst [smem:[#allocation16_spill]] %s2069_s29  ;;  %s1726_s19 = sadd.s32 4294967294, %s2073_s30  }
   0xc   : > { %s2209_s1 = sadd.s32 1, %s2073_s30   ;;  %s428_s20 = sadd.s32 1, %s2069_s29 }
   0xd   : > { %2716 = sst [smem:[#allocation17_spill]] %s2209_s1  ;;  %s425_s21 = ssub.s32 %s2073_s30, %s2209_s1 }
   0xe   : > { %p438_p0 = scmp.ne.s32.totalorder %s2069_s29, %s2065_s28  ;;  %p426_p1 = scmp.eq.s32.totalorder %s425_s21, 0 }
   0xf   : > { %p439_p2 = scmp.eq.s32.totalorder %s2205_s0, 1  ;;  %p444_p3 = scmp.ne.s32.totalorder %s2065_s28, %s2061_s27 }
  0x10   : > { %p445_p4 = scmp.eq.s32.totalorder %s1726_s19, 1  ;;  %p1727_p7 = scmp.ge.s32.totalorder %s2073_s30, 1 }
  0x11   : > { %s2220_s22 = scalar_select %p426_p1, %s2069_s29, %s428_s20  }
  0x12   : > { %p2222_p5 = por %p439_p2, %p438_p0  ;;  %p2226_p6 = por %p445_p4, %p444_p3 }
  0x13   : > { %2717 = sst [smem:[#allocation18_spill]] %s2220_s22  ;;  %p452_p8 = scmp.lt.s32.totalorder %s2073_s30, 3 }
  0x14   : > { %s2719_s23 = scalar_select %p2226_p6, 1, 0 }
  0x15   : > { %p1850_p9 = scmp.eq.s32.totalorder %s2205_s0, 0  ;;  %p2233_p10 = pnand %p1727_p7, %p452_p8 }
  0x16   : > { %2720 = sst [smem:[#allocation19_spill]] %s2719_s23  ;;  %s2075_s20 = smov [#allocation6]  }
  0x17   : > { %s2722_s3 = sld [smem:[#allocation23_spill]]  ;;  %p1839_p11 = pneg %p2233_p10 }
  0x18   : > { %s469_s21 = sshll.u32 %s2075_s20, 4  ;;  %s494_s1 = sshll.u32 %s2687_s9, 4  ;;  %s470_s21 = int_to_ptr.vmem [resolvable:$true] %s469_s21  ;;  %s495_s1 = int_to_ptr.hbm [resolvable:$true] %s494_s1 }
  0x19   : > { %p1840_p12 = pnand %p1850_p9, %p1839_p11  ;;  %s2076_s23 = smov [#allocation9]  }
  0x1a   : > { %s496_s27 = sshll.u32 %s2076_s23, 4  ;;  %548 = sbr.rel (%p2233_p10) target bundleno = 2731 (0xaab), region = 92  ;;  %s497_s27 = int_to_ptr.vmem [resolvable:$true] %s496_s27 }
  0x1b   : > { %1845 = dma.hbm_to_vmem [thread:$0]  (!%p1840_p12), %s495_s1, 64, %s497_s27, [#allocation10]  }
  0x1d   : > { %s467_s19 = sshll.u32 %s2722_s3, 4  ;;  %s468_s19 = int_to_ptr.hbm [resolvable:$true] %s467_s19 }
  0x1e   : > { %1842 = dma.hbm_to_vmem [thread:$0]  (!%p1840_p12), %s468_s19, 64, %s470_s21, [#allocation7]  }
  0x1f   : > { %2048 = dma.done.wait (%p1850_p9), [#allocation7], 64  }
  0x20   : > { %2050 = vsyncadd (%p1850_p9), [#allocation7], 4294967232 }
  0x21   : > { %2052 = dma.done.wait (%p1850_p9), [#allocation10], 64  }
  0x22   : > { %2054 = vsyncadd (%p1850_p9), [#allocation10], 4294967232  ;;  %p612_p13 = scmp.lt.s32.totalorder %s2205_s0, 1  ;;  %vm624_vm0 = vcmask 64512   ;;  %v2077_v0 = vmov 0.0   ;;  %vm628_vm1 = vcmask 58368   ;;  %v686_v20 = vlaneseq }
  0x23   : > { %625 = vst.msk [vmem:[#allocation2] sm:$0xff] %vm624_vm0, %v2077_v0  ;;  %s2723_s23 = sld [smem:[#allocation20_spill]]  ;;  %s2705_s25 = smov 8   ;;  %vm676_vm2 = vcmask 130048   ;;  %vm682_vm3 = vcmask 261120   ;;  %vm738_vm4 = vcmask 1043456  }
  0x24   : > { %s2261_s27 = scalar_select %p612_p13, %s2205_s0, 1  ;;  %626 = vst.msk [vmem:[#allocation2 + $0x8] sm:$0xff] %vm624_vm0, %v2077_v0  ;;  %v687_v23 = vshrl.u32 %v686_v20, 7  ;;  %v689_v24 = vand.u32 127, %v686_v20  ;;  %vm679_vm5 = vcmask 195584   ;;  %vm734_vm7 = vcmask 326656  }
  0x25   : > { %627 = vst.msk [vmem:[#allocation2 + $0x10] sm:$0xff] %vm624_vm0, %v2077_v0  ;;  %s2703_s26 = smov 24   ;;  %s2080_s19 = smov 16   ;;  %v2082_v53 = vmov 8.0   ;;  %v717_v54 = vld [vmem:[#allocation6] sm:$0x7] }
  0x26   : > { %s1813_s29 = sshll.u32 %s2261_s27, 4  ;;  %629 = vst.msk [vmem:[#allocation2 + $0x18] sm:$0x3] %vm628_vm1, %v2077_v0  ;;  %s2081_s20 = smov 32   ;;  %v690_v25 = vmul.u32 2, %v687_v23  ;;  %1923 = vrcp.f32 %v2082_v53  ;;  %v718_v56 = vperm.slane %v717_v54, 0 }
  0x27   : > { %797 = vst.msk [vmem:[#allocation3] sm:$0xff] %vm676_vm2, %v2077_v0  ;;  %s2724_s1 = sld [smem:[#allocation22_spill]]  ;;  %vm799_vm9 = vcmask 123904   ;;  %s2085_s21 = smov 64  }
  0x28   : > { %798 = vst.msk [vmem:[#allocation3 + $0x8] sm:$0xff] %vm676_vm2, %v2077_v0  ;;  %vm691_vm6 = vcmp.eq.s32.totalorder %v689_v24, %v690_v25  ;;  %s2088_s22 = smov 112  }
  0x29   : > { %s616_s24 = scalar_lea.vmem %s2723_s23, %s1813_s29  ;;  %1011 = vst.msk [vmem:[#allocation4] sm:$0xff] %vm676_vm2, %v2077_v0  ;;  %v1738_v44 = vsel %vm691_vm6, 1.0, %v2077_v0  ;;  %s2707_s29 = smov 120  }
  0x2a   : > { %v622_v1 = vld [vmem:[%s616_s24] sm:$0xff]  ;;  %v623_v2 = vld [vmem:[%s616_s24 + $0x8] sm:$0xff]  ;;  %1164 = vst.msk [vmem:[#allocation5] sm:$0xff] %vm682_vm3, %v2077_v0  ;;  %v2304_v48 = vpack.c.bf16 %v1738_v44, %v1738_v44  ;;  %s2084_s24 = smov 48   ;;  %s2727_s23 = smov 24  }
  0x2b   : > { %630 = vst.msk [vmem:[#allocation2 + $0x8] sm:$0xff] %vm624_vm0, %v622_v1 }
  0x2c   : > { %631 = vst.msk [vmem:[#allocation2 + $0x10] sm:$0xff] %vm624_vm0, %v623_v2  ;;  %v1924_v55 = vpop.eup %1923 }
  0x2d   : > { %1012 = vst.msk [vmem:[#allocation4 + $0x8] sm:$0xff] %vm676_vm2, %v2077_v0  ;;  %v716_v15 = vld [vmem:[%s2724_s1 + $0x10] sm:$0xf]  ;;  %v1815_v19 = vld [vmem:[%s2724_s1 + $0x8] sm:$0xff]  ;;  %v1814_v49 = vld [vmem:[%s2724_s1] sm:$0xff]  ;;  %v764_v57 = vmul.f32 8.0, %v1924_v55  ;;  %vm768_vm8 = vweird.f32 %v1924_v55 }
  0x2e   : > { %v728_v16 = vunpack.c.l.b16 %v716_v15  ;;  %800 = vst.msk [vmem:[#allocation3 + $0x10] sm:$0x3] %vm799_vm9, %v2077_v0  ;;  %s2725_s1 = smov 120  }
  0x2f   : > { %v765_v61 = vsub.f32 1.0, %v764_v57  ;;  %1013 = vst.msk [vmem:[#allocation4 + $0x10] sm:$0x3] %vm799_vm9, %v2077_v0  ;;  %vm1040_vm9 = vcmask 523264  }
  0x30   : > { %v731_v17 = vpack.c.b16 %v728_v16, %v728_v16 }
  0x31   : > { %v766_v1 = vmul.f32 %v1924_v55, %v765_v61 }
  0x32   : > { %v634_v3 = vld [vmem:[#allocation2 + $0x7] sm:$0xff]  ;;  %v740_v18 = vsel %vm738_vm4, %v731_v17, 0 }
  0x33   : > { %v635_v4 = vld [vmem:[#allocation2 + $0xf] sm:$0xff]  ;;  %747 = vmatpush.bf16.msra.mxu1 %v740_v18  ;;  %v632_v28 = vld [vmem:[#allocation2 + $0x6] sm:$0xff] }
  0x34   : > { %v638_v5 = vld [vmem:[#allocation2 + $0x9] sm:$0xff]  ;;  %v639_v6 = vld [vmem:[#allocation2 + $0x11] sm:$0xff]  ;;  %v1901_v7 = vpack.i.bf16 %v635_v4, %v634_v3 }
  0x35   : > { %v1911_v8 = vpack.i.bf16 %v639_v6, %v638_v5  ;;  %v636_v9 = vld [vmem:[#allocation2 + $0x8] sm:$0xff]  ;;  %v637_v10 = vld [vmem:[#allocation2 + $0x10] sm:$0xff]  ;;  %v767_v5 = vadd.f32 %v1924_v55, %v766_v1 }
  0x36   : > { %1902 = vrot.lane.b32.xlu0 %v1901_v7, %s2705_s25  ;;  %v640_v11 = vld [vmem:[#allocation2 + $0xa] sm:$0xff]  ;;  %v641_v12 = vld [vmem:[#allocation2 + $0x12] sm:$0xff]  ;;  %v1906_v13 = vpack.i.bf16 %v637_v10, %v636_v9 }
  0x37   : > { %1912 = vrot.lane.b32.xlu1 %v1911_v8, %s2703_s26  ;;  %v1916_v14 = vpack.i.bf16 %v641_v12, %v640_v11  ;;  %748 = vmatpush.bf16.msra.mxu1 %v1815_v19  ;;  %v633_v29 = vld [vmem:[#allocation2 + $0xe] sm:$0xff]  ;;  %v2312_v8 = vsel %vm768_vm8, %v1924_v55, %v767_v5  ;;  %vm1038_vm8 = vcmask 392192  }
  0x3b   : > { %749 = vmatpush.bf16.msra.mxu1 %v1814_v49 }
  0x3e   : > { %1907 = vrot.lane.b32.xlu0 %v1906_v13, %s2080_s19 }
  0x3f   : > { %1917 = vrot.lane.b32.xlu1 %v1916_v14, %s2081_s20 }
  0xa8   : > { %v1903_v21 = vpop.permute.xlu0 %1902 }
  0xa9   : > { %v1913_v22 = vpop.permute.xlu1 %1912  ;;  %v1905_v26 = vunpack.i.h.bf16 %v1903_v21  ;;  %v1904_v27 = vunpack.i.l.bf16 %v1903_v21 }
  0xaa   : > { %v1915_v38 = vunpack.i.h.bf16 %v1913_v22  ;;  %v1914_v39 = vunpack.i.l.bf16 %v1913_v22 }
  0xab   : > { %v674_v36 = vsel %vm624_vm0, %v632_v28, %v1904_v27  ;;  %v675_v37 = vsel %vm624_vm0, %v633_v29, %v1905_v26  ;;  %v793_v28 = vperm.slane %v717_v54, 1 }
  0xb0   : > { %v1908_v30 = vpop.permute.xlu0 %1907 }
  0xb1   : > { %v1918_v31 = vpop.permute.xlu1 %1917  ;;  %v1910_v32 = vunpack.i.h.bf16 %v1908_v30  ;;  %v1909_v33 = vunpack.i.l.bf16 %v1908_v30 }
  0xb2   : > { %v1920_v34 = vunpack.i.h.bf16 %v1918_v31  ;;  %v1919_v35 = vunpack.i.l.bf16 %v1918_v31  ;;  %v795_v31 = vperm.slane %v717_v54, 2 }
  0xb3   : > { %v677_v40 = vsel %vm676_vm2, %v674_v36, %v1909_v33  ;;  %v678_v41 = vsel %vm676_vm2, %v675_v37, %v1910_v32 }
  0xb4   : > { %v680_v42 = vsel %vm679_vm5, %v677_v40, %v1914_v39  ;;  %v681_v43 = vsel %vm679_vm5, %v678_v41, %v1915_v38  ;;  %v803_v41 = vld [vmem:[%s2682_s4] sm:$0xff] }
  0xb5   : > { %v683_v45 = vsel %vm682_vm3, %v680_v42, %v1919_v35  ;;  %v684_v46 = vsel %vm682_vm3, %v681_v43, %v1920_v34  ;;  %v818_v42 = vperm.slane %v803_v41, 1  ;;  %v811_v44 = vperm.slane %v803_v41, 0 }
  0xb6   : > { %v685_v47 = vpack.c.bf16 %v684_v46, %v683_v45  ;;  %v850_v1 = vperm.slane %v803_v41, 5 }
  0xb8   : > { %705 = vmatpush.bf16.msra.mxu0 %v685_v47  ;;  %v827_v47 = vperm.slane %v803_v41, 2 }
  0xbb   : > { %1739 = vmatmul.msk.bf16.vlgmr.msra.gmra.mxu0 %vm676_vm2, %v2304_v48 }
 0x138   : > { %v707_v50 = vpop.f32.mrf.mxu0 }
 0x139   : > { %v711_v51 = vpack.c.bf16 %v707_v50, %v707_v50 }
 0x13b   : > { %1748 = vmatmul.msk.bf16.vlgmr.msra.gmra.mxu1 %vm734_vm7, %v711_v51  ;;  %v834_v51 = vperm.slane %v803_v41, 3 }
 0x140   : > { %v709_v52 = vpop.f32.mrf.mxu0 }
 0x1b8   : > { %v751_v58 = vpop.f32.mrf.mxu1 }
 0x1b9   : > { %v752_v59 = vadd.f32 %v751_v58, %v718_v56  ;;  %v843_v58 = vperm.slane %v803_v41, 4 }
 0x1bb   : > { %v755_v60 = vmax.f32 %v752_v59, 0.0 }
 0x1bd   : > { %v756_v62 = vsel %vm676_vm2, %v755_v60, 0.0 }
 0x1be   : > { %v757_v63 = vrot.slane %v756_v62, 4 }
 0x1c0   : > { %v758_v2 = vadd.f32 %v757_v63, %v756_v62  ;;  %v753_v3 = vpop.f32.mrf.mxu1  ;;  %v1816_v62 = vld [vmem:[%s2684_s6] sm:$0xff] }
 0x1c1   : > { %943 = vmatpush.bf16.msra.mxu2 %v1816_v62  ;;  %v859_v3 = vperm.slane %v803_v41, 6 }
 0x1c2   : > { %v759_v4 = vrot.slane %v758_v2, 2 }
 0x1c4   : > { %v760_v6 = vadd.f32 %v759_v4, %v758_v2 }
 0x1c6   : > { %v761_v7 = vrot.slane %v760_v6, 1 }
 0x1c8   : > { %v762_v9 = vadd.f32 %v761_v7, %v760_v6 }
 0x1ca   : > { %v770_v10 = vmul.f32 %v2312_v8, %v762_v9 }
 0x1cc   : > { %v771_v11 = vsub.f32 %v755_v60, %v770_v10 }
 0x1ce   : > { %v772_v12 = vmul.f32 %v771_v11, %v771_v11 }
 0x1d0   : > { %v773_v13 = vsel %vm676_vm2, %v772_v12, 0.0  ;;  %v804_v12 = vld [vmem:[%s2682_s4 + $0x8] sm:$0x3] }
 0x1d1   : > { %v774_v14 = vrot.slane %v773_v13, 4 }
 0x1d3   : > { %v775_v15 = vadd.f32 %v774_v14, %v773_v13  ;;  %v866_v13 = vperm.slane %v803_v41, 7 }
 0x1d5   : > { %v776_v16 = vrot.slane %v775_v15, 2 }
 0x1d7   : > { %v777_v17 = vadd.f32 %v776_v16, %v775_v15 }
 0x1d9   : > { %v778_v18 = vrot.slane %v777_v17, 1 }
 0x1db   : > { %v779_v19 = vadd.f32 %v778_v18, %v777_v17  ;;  %v875_v18 = vperm.slane %v804_v12, 0 }
 0x1dd   : > { %v780_v20 = vmul.f32 %v779_v19, %v2312_v8 }
 0x1df   : > { %v781_v21 = vadd.f32 1e-05, %v780_v20  ;;  %v882_v20 = vperm.slane %v804_v12, 1 }
 0x1e1   : > { %1925 = vrsqrt.f32 %v781_v21  ;;  %vm788_vm11 = vweird.f32 %v781_v21 }
 0x1e7   : > { %v1926_v22 = vpop.eup %1925 }
 0x1e8   : > { %v783_v23 = vmul.f32 %v1926_v22, %v781_v21  ;;  %vm789_vm10 = vweird.f32 %v1926_v22 }
 0x1e9   : > { %vm790_vm12 = vmor %vm788_vm11, %vm789_vm10  ;;  %vm1104_vm10 = vcmask 654336   ;;  %vm1122_vm11 = vcmask 257024  }
 0x1ea   : > { %v784_v24 = vmul.f32 %v1926_v22, %v783_v23 }
 0x1ec   : > { %v785_v25 = vmul.f32 0.5, %v784_v24  ;;  %v2354_v24 = vld [vmem:[%s2683_s5] sm:$0x7f] }
 0x1ee   : > { %v786_v26 = vsub.f32 1.5, %v785_v25 }
 0x1f0   : > { %v787_v27 = vmul.f32 %v1926_v22, %v786_v26 }
 0x1f2   : > { %v791_v29 = vsel %vm790_vm12, %v1926_v22, %v787_v27 }
 0x1f3   : > { %v792_v30 = vmul.f32 %v791_v29, %v771_v11  ;;  %v885_v29 = vperm.slane %v2354_v24, 0 }
 0x1f5   : > { %v794_v32 = vmul.f32 %v793_v28, %v792_v30 }
 0x1f7   : > { %v2319_v33 = vadd.f32 %v795_v31, %v794_v32 }
 0x1f9   : > { %801 = vst.msk [vmem:[#allocation3 + $0x8] sm:$0xff] %vm676_vm2, %v2319_v33 }
 0x200   : > { %v821_v34 = vld [vmem:[#allocation3 + $0x7] sm:$0xff] }
 0x201   : > { %v805_v35 = vld [vmem:[#allocation3 + $0x6] sm:$0xff]  ;;  %830 = vrot.lane.b32.xlu1 %v821_v34, %s2707_s29  ;;  %823 = vrot.lane.b32.xlu0 %v821_v34, %s2705_s25 }
 0x202   : > { %807 = vrot.lane.b32.xlu2 %v805_v35, %s2705_s25  ;;  %v853_v36 = vld [vmem:[#allocation3 + $0x9] sm:$0xff] }
 0x203   : > { %v837_v37 = vld [vmem:[#allocation3 + $0x8] sm:$0xff] }
 0x204   : > { %v869_v38 = vld [vmem:[#allocation3 + $0xa] sm:$0xff] }
 0x209   : > { %855 = vrot.lane.b32.xlu1 %v853_v36, %s2705_s25  ;;  %846 = vrot.lane.b32.xlu0 %v837_v37, %s2707_s29 }
 0x20a   : > { %814 = vrot.lane.b32.xlu2 %v805_v35, %s2707_s29 }
 0x211   : > { %878 = vrot.lane.b32.xlu1 %v869_v38, %s2707_s29  ;;  %871 = vrot.lane.b32.xlu0 %v869_v38, %s2705_s25 }
 0x212   : > { %839 = vrot.lane.b32.xlu2 %v837_v37, %s2705_s25  ;;  %s609_s25 = sand.u32 1, %s2065_s28  }
 0x213   : > { %s1734_s26 = sshll.u32 %s609_s25, 2 }
 0x21a   : > { %862 = vrot.lane.b32.xlu2 %v853_v36, %s2707_s29  ;;  %s2726_s29 = smov 8  }
 0x25c   : > { %v808_v39 = vpop.permute.xlu2 %807 }
 0x25d   : > { %v810_v45 = vsel %vm624_vm0, %v805_v35, %v808_v39 }
 0x25e   : > { %v812_v50 = vmul.f32 %v811_v44, %v810_v45 }
 0x264   : > { %v815_v40 = vpop.permute.xlu2 %814 }
 0x265   : > { %v817_v43 = vsel %vm624_vm0, %v815_v40, %v805_v35 }
 0x266   : > { %v819_v46 = vmul.f32 %v818_v42, %v817_v43 }
 0x268   : > { %v820_v56 = vadd.f32 %v819_v46, %v812_v50 }
 0x26c   : > { %v840_v49 = vpop.permute.xlu2 %839 }
 0x26d   : > { %v842_v61 = vsel %vm624_vm0, %v837_v37, %v840_v49 }
 0x26e   : > { %v844_v2 = vmul.f32 %v843_v58, %v842_v61  ;;  %v919_v61 = vperm.slane %v2354_v24, 1 }
 0x273   : > { %v831_v52 = vpop.permute.xlu1 %830  ;;  %v824_v53 = vpop.permute.xlu0 %823 }
 0x274   : > { %v833_v54 = vsel %vm624_vm0, %v831_v52, %v821_v34  ;;  %v826_v55 = vsel %vm624_vm0, %v821_v34, %v824_v53  ;;  %v863_v9 = vpop.permute.xlu2 %862 }
 0x275   : > { %v828_v57 = vmul.f32 %v827_v47, %v826_v55  ;;  %v835_v59 = vmul.f32 %v834_v51, %v833_v54  ;;  %v865_v16 = vsel %vm624_vm0, %v863_v9, %v853_v36 }
 0x276   : > { %v867_v19 = vmul.f32 %v866_v13, %v865_v16  ;;  %v953_v13 = vperm.slane %v2354_v24, 4 }
 0x277   : > { %v829_v60 = vadd.f32 %v828_v57, %v820_v56 }
 0x279   : > { %v836_v63 = vadd.f32 %v835_v59, %v829_v60 }
 0x27b   : > { %v856_v4 = vpop.permute.xlu1 %855  ;;  %v847_v5 = vpop.permute.xlu0 %846  ;;  %v845_v10 = vadd.f32 %v844_v2, %v836_v63 }
 0x27c   : > { %v858_v6 = vsel %vm624_vm0, %v853_v36, %v856_v4  ;;  %v849_v7 = vsel %vm624_vm0, %v847_v5, %v837_v37  ;;  %v1817_v5 = vld [vmem:[%s2685_s7] sm:$0xff] }
 0x27d   : > { %v851_v11 = vmul.f32 %v850_v1, %v849_v7  ;;  %v860_v14 = vmul.f32 %v859_v3, %v858_v6  ;;  %v921_v1 = vperm.slane %v2354_v24, 2  ;;  %970 = vmatpush.bf16.msra.mxu3 %v1817_v5  ;;  %v926_v6 = vperm.slane %v2354_v24, 3  ;;  %v1818_v5 = vld [vmem:[%s2686_s8] sm:$0xff] }
 0x27f   : > { %v852_v15 = vadd.f32 %v851_v11, %v845_v10 }
 0x281   : > { %v861_v17 = vadd.f32 %v860_v14, %v852_v15 }
 0x283   : > { %v879_v21 = vpop.permute.xlu1 %878  ;;  %v872_v22 = vpop.permute.xlu0 %871  ;;  %v868_v26 = vadd.f32 %v867_v19, %v861_v17 }
 0x284   : > { %v881_v23 = vsel %vm624_vm0, %v879_v21, %v869_v38  ;;  %v874_v25 = vsel %vm624_vm0, %v869_v38, %v872_v22 }
 0x285   : > { %v876_v27 = vmul.f32 %v875_v18, %v874_v25  ;;  %v883_v28 = vmul.f32 %v882_v20, %v881_v23 }
 0x287   : > { %v877_v30 = vadd.f32 %v876_v27, %v868_v26 }
 0x289   : > { %v884_v31 = vadd.f32 %v883_v28, %v877_v30 }
 0x28b   : > { %v886_v32 = vadd.f32 %v885_v29, %v884_v31 }
 0x28d   : > { %v887_v34 = vmax.f32 %v886_v32, 0.0 }
 0x28f   : > { %v888_v35 = vadd.f32 %v887_v34, %v2319_v33 }
 0x291   : > { %v889_v36 = vsel %vm676_vm2, %v888_v35, 0.0 }
 0x292   : > { %v890_v37 = vrot.slane %v889_v36, 4 }
 0x294   : > { %v891_v39 = vadd.f32 %v890_v37, %v889_v36 }
 0x296   : > { %v892_v40 = vrot.slane %v891_v39, 2 }
 0x298   : > { %v893_v41 = vadd.f32 %v892_v40, %v891_v39 }
 0x29a   : > { %v894_v42 = vrot.slane %v893_v41, 1 }
 0x29c   : > { %v895_v43 = vadd.f32 %v894_v42, %v893_v41 }
 0x29e   : > { %v896_v38 = vmul.f32 %v895_v43, %v2312_v8 }
 0x2a0   : > { %v897_v44 = vsub.f32 %v888_v35, %v896_v38 }
 0x2a2   : > { %v898_v45 = vmul.f32 %v897_v44, %v897_v44 }
 0x2a4   : > { %v899_v46 = vsel %vm676_vm2, %v898_v45, 0.0  ;;  %v1007_v45 = vperm.slane %v2354_v24, 5 }
 0x2a5   : > { %v900_v47 = vrot.slane %v899_v46, 4 }
 0x2a7   : > { %v901_v49 = vadd.f32 %v900_v47, %v899_v46 }
 0x2a9   : > { %v902_v50 = vrot.slane %v901_v49, 2 }
 0x2ab   : > { %v903_v51 = vadd.f32 %v902_v50, %v901_v49  ;;  %v1009_v49 = vperm.slane %v2354_v24, 6  ;;  %v1822_v24 = vld [vmem:[%s2686_s8 + $0x20] sm:$0xff] }
 0x2ac   : > { %1111 = vmatpush.bf16.msrb.mxu2 %v1822_v24 }
 0x2ad   : > { %v904_v52 = vrot.slane %v903_v51, 1 }
 0x2af   : > { %v905_v33 = vadd.f32 %v904_v52, %v903_v51 }
 0x2b1   : > { %v906_v53 = vmul.f32 %v905_v33, %v2312_v8 }
 0x2b3   : > { %v907_v54 = vadd.f32 1e-05, %v906_v53 }
 0x2b5   : > { %1927 = vrsqrt.f32 %v907_v54  ;;  %vm914_vm14 = vweird.f32 %v907_v54 }
 0x2bb   : > { %v1928_v55 = vpop.eup %1927 }
 0x2bc   : > { %v909_v56 = vmul.f32 %v1928_v55, %v907_v54  ;;  %vm915_vm13 = vweird.f32 %v1928_v55  ;;  %v1821_v54 = vld [vmem:[%s2686_s8 + $0x18] sm:$0xff] }
 0x2bd   : > { %vm916_vm15 = vmor %vm914_vm14, %vm915_vm13  ;;  %1112 = vmatpush.bf16.msrb.mxu2 %v1821_v54  ;;  %vm1165_vm13 = vcmask 259072  }
 0x2be   : > { %v910_v57 = vmul.f32 %v1928_v55, %v909_v56  ;;  %v1819_v56 = vld [vmem:[%s2686_s8 + $0x8] sm:$0xff]  ;;  %1166 = vst.msk [vmem:[#allocation5 + $0x8] sm:$0x3f] %vm1165_vm13, %v2077_v0 }
 0x2c0   : > { %v911_v58 = vmul.f32 0.5, %v910_v57 }
 0x2c2   : > { %v912_v59 = vsub.f32 1.5, %v911_v58 }
 0x2c4   : > { %v913_v60 = vmul.f32 %v1928_v55, %v912_v59 }
 0x2c6   : > { %v917_v62 = vsel %vm916_vm15, %v1928_v55, %v913_v60  ;;  %v1820_v55 = vld [vmem:[%s2686_s8 + $0x10] sm:$0xff] }
 0x2c7   : > { %v918_v63 = vmul.f32 %v917_v62, %v897_v44  ;;  %1113 = vmatpush.bf16.msrb.mxu2 %v1820_v55 }
 0x2c9   : > { %v920_v2 = vmul.f32 %v919_v61, %v918_v63 }
 0x2cb   : > { %v922_v3 = vadd.f32 %v921_v1, %v920_v2  ;;  %1114 = vmatpush.bf16.msrb.mxu2 %v1819_v56 }
 0x2cd   : > { %v923_v4 = vpack.c.bf16 %v922_v3, %v922_v3 }
 0x2cf   : > { %1753 = vmatmul.msk.bf16.vlgmr.msra.gmra.mxu2 %vm676_vm2, %v923_v4 }
 0x2d0   : > { %1115 = vmatpush.bf16.msrb.mxu2 %v1818_v5 }
 0x352   : > { %v945_v7 = vpop.f32.mrf.mxu2 }
 0x353   : > { %v946_v9 = vadd.f32 %v945_v7, %v926_v6 }
 0x355   : > { %v949_v10 = vmax.f32 %v946_v9, 0.0 }
 0x357   : > { %v950_v11 = vpack.c.bf16 %v949_v10, %v949_v10  ;;  %v2086_v10 = vmov 4.0  }
 0x359   : > { %1758 = vmatmul.msk.bf16.vlgmr.msra.gmra.mxu3 %vm676_vm2, %v950_v11  ;;  %v1072_v11 = vld [vmem:[#allocation9] sm:$0x7] }
 0x35a   : > { %v947_v12 = vpop.f32.mrf.mxu2 }
 0x3dc   : > { %v972_v14 = vpop.f32.mrf.mxu3 }
 0x3dd   : > { %v973_v15 = vadd.f32 %v972_v14, %v953_v13  ;;  %v1073_v13 = vperm.slane %v1072_v11, 0 }
 0x3df   : > { %v976_v16 = vadd.f32 %v973_v15, %v922_v3 }
 0x3e1   : > { %v977_v17 = vsel %vm676_vm2, %v976_v16, 0.0 }
 0x3e2   : > { %v978_v18 = vrot.slane %v977_v17, 4 }
 0x3e4   : > { %v979_v19 = vadd.f32 %v978_v18, %v977_v17  ;;  %v974_v20 = vpop.f32.mrf.mxu3 }
 0x3e6   : > { %v980_v21 = vrot.slane %v979_v19, 2 }
 0x3e8   : > { %v981_v22 = vadd.f32 %v980_v21, %v979_v19 }
 0x3ea   : > { %v982_v23 = vrot.slane %v981_v22, 1 }
 0x3ec   : > { %v983_v25 = vadd.f32 %v982_v23, %v981_v22 }
 0x3ee   : > { %v984_v26 = vmul.f32 %v983_v25, %v2312_v8 }
 0x3f0   : > { %v985_v27 = vsub.f32 %v976_v16, %v984_v26 }
 0x3f2   : > { %v986_v28 = vmul.f32 %v985_v27, %v985_v27 }
 0x3f4   : > { %v987_v29 = vsel %vm676_vm2, %v986_v28, 0.0 }
 0x3f5   : > { %v988_v30 = vrot.slane %v987_v29, 4 }
 0x3f7   : > { %v989_v31 = vadd.f32 %v988_v30, %v987_v29 }
 0x3f9   : > { %v990_v32 = vrot.slane %v989_v31, 2 }
 0x3fb   : > { %v991_v34 = vadd.f32 %v990_v32, %v989_v31 }
 0x3fd   : > { %v992_v35 = vrot.slane %v991_v34, 1 }
 0x3ff   : > { %v993_v36 = vadd.f32 %v992_v35, %v991_v34 }
 0x401   : > { %v994_v37 = vmul.f32 %v993_v36, %v2312_v8 }
 0x403   : > { %v995_v39 = vadd.f32 1e-05, %v994_v37 }
 0x405   : > { %1929 = vrsqrt.f32 %v995_v39  ;;  %vm1002_vm6 = vweird.f32 %v995_v39 }
 0x406   : > { %1931 = vrcp.f32 %v2086_v10 }
 0x40b   : > { %v1930_v40 = vpop.eup %1929 }
 0x40c   : > { %v997_v41 = vmul.f32 %v1930_v40, %v995_v39  ;;  %vm1003_vm1 = vweird.f32 %v1930_v40  ;;  %v1932_v12 = vpop.eup %1931 }
 0x40d   : > { %vm1004_vm7 = vmor %vm1002_vm6, %vm1003_vm1  ;;  %v1131_v14 = vmul.f32 4.0, %v1932_v12  ;;  %vm1135_vm12 = vweird.f32 %v1932_v12 }
 0x40e   : > { %v998_v42 = vmul.f32 %v1930_v40, %v997_v41 }
 0x40f   : > { %v1132_v17 = vsub.f32 1.0, %v1131_v14 }
 0x410   : > { %v999_v43 = vmul.f32 0.5, %v998_v42 }
 0x411   : > { %v1133_v20 = vmul.f32 %v1932_v12, %v1132_v17 }
 0x412   : > { %v1000_v38 = vsub.f32 1.5, %v999_v43 }
 0x413   : > { %v1134_v25 = vadd.f32 %v1932_v12, %v1133_v20 }
 0x414   : > { %v1001_v44 = vmul.f32 %v1930_v40, %v1000_v38 }
 0x415   : > { %v2402_v28 = vsel %vm1135_vm12, %v1932_v12, %v1134_v25 }
 0x416   : > { %v1005_v46 = vsel %vm1004_vm7, %v1930_v40, %v1001_v44 }
 0x417   : > { %v1006_v47 = vmul.f32 %v1005_v46, %v985_v27 }
 0x419   : > { %v1008_v50 = vmul.f32 %v1007_v45, %v1006_v47 }
 0x41b   : > { %v1010_v51 = vadd.f32 %v1009_v49, %v1008_v50  ;;  %v1160_v50 = vperm.slane %v1072_v11, 1 }
 0x41d   : > { %1014 = vst.msk [vmem:[#allocation4 + $0x8] sm:$0xff] %vm676_vm2, %v1010_v51 }
 0x424   : > { %v1018_v8 = vld [vmem:[#allocation4 + $0x9] sm:$0xff] }
 0x425   : > { %v1017_v52 = vld [vmem:[#allocation4 + $0x8] sm:$0xff]  ;;  %1029 = vrot.lane.b32.xlu1 %v1018_v8, %s2084_s24  ;;  %s1737_s24 = sshll.u32 %s2261_s27, 2  ;;  %s611_s27 = scalar_lea.vmem [#allocation11], %s1734_s26 }
 0x426   : > { %v1016_v33 = vld [vmem:[#allocation4 + $0x7] sm:$0xff]  ;;  %1025 = vrot.lane.b32.xlu0 %v1017_v52, %s2081_s20  ;;  %v1162_v52 = vperm.slane %v1072_v11, 2 }
 0x427   : > { %1021 = vrot.lane.b32.xlu2 %v1016_v33, %s2080_s19  ;;  %v1019_v53 = vld [vmem:[#allocation4 + $0xa] sm:$0xff] }
 0x428   : > { %v1015_v58 = vld [vmem:[#allocation4 + $0x6] sm:$0xff] }
 0x42f   : > { %1033 = vrot.lane.b32.xlu2 %v1019_v53, %s2085_s21  ;;  %s2087_s21 = smov 104  }
 0x481   : > { %v1022_v57 = vpop.permute.xlu2 %1021 }
 0x482   : > { %v1036_v59 = vsel %vm676_vm2, %v1015_v58, %v1022_v57 }
 0x489   : > { %v1034_v63 = vpop.permute.xlu2 %1033 }
 0x497   : > { %v1030_v60 = vpop.permute.xlu1 %1029 }
 0x498   : > { %v1026_v61 = vpop.permute.xlu0 %1025 }
 0x499   : > { %v1037_v62 = vsel %vm682_vm3, %v1036_v59, %v1026_v61 }
 0x49a   : > { %v1039_v1 = vsel %vm1038_vm8, %v1037_v62, %v1030_v60 }
 0x49b   : > { %v1041_v2 = vsel %vm1040_vm9, %v1039_v1, %v1034_v63 }
 0x49c   : > { %v1042_v3 = vpack.c.bf16 %v1041_v2, %v1041_v2 }
 0x49e   : > { %v1046_v4 = vsel %vm738_vm4, %v1042_v3, 0 }
 0x49f   : > { %1055 = vmatpush.bf16.msrb.mxu0 %v1046_v4 }
 0x4a2   : > { %1759 = vmatmul.msk.bf16.vlgmr.msrb.gmra.mxu0 %vm624_vm0, %v2304_v48 }
 0x51f   : > { %v1057_v6 = vpop.f32.mrf.mxu0 }
 0x520   : > { %v1061_v7 = vpack.c.bf16 %v1057_v6, %v1057_v6 }
 0x522   : > { %1780 = vmatmul.msk.bf16.vlgmr.msrb.gmra.mxu2 %vm1104_vm10, %v1061_v7  ;;  %v2484_v7 = vld [vmem:[%s2688_s10] sm:$0xff] }
 0x523   : > { %v1186_v12 = vperm.slane %v2484_v7, 0 }
 0x527   : > { %v1059_v9 = vpop.f32.mrf.mxu0 }
 0x5a5   : > { %v1117_v15 = vpop.f32.mrf.mxu2 }
 0x5a6   : > { %v1118_v16 = vadd.f32 %v1117_v15, %v1073_v13 }
 0x5a8   : > { %v1121_v48 = vmax.f32 %v1118_v16, 0.0  ;;  %v1195_v16 = vperm.slane %v2484_v7, 1 }
 0x5aa   : > { %v1123_v18 = vsel %vm1122_vm11, %v1121_v48, 0.0 }
 0x5ab   : > { %v1124_v19 = vrot.slane %v1123_v18, 4 }
 0x5ad   : > { %v1125_v21 = vadd.f32 %v1124_v19, %v1123_v18  ;;  %v1119_v22 = vpop.f32.mrf.mxu2  ;;  %v1204_v18 = vperm.slane %v2484_v7, 2 }
 0x5af   : > { %v1126_v23 = vrot.slane %v1125_v21, 2 }
 0x5b1   : > { %v1127_v26 = vadd.f32 %v1126_v23, %v1125_v21 }
 0x5b3   : > { %v1128_v27 = vrot.slane %v1127_v26, 1 }
 0x5b5   : > { %v1129_v29 = vadd.f32 %v1128_v27, %v1127_v26 }
 0x5b7   : > { %v1137_v30 = vmul.f32 %v2402_v28, %v1129_v29 }
 0x5b9   : > { %v1138_v31 = vsub.f32 %v1121_v48, %v1137_v30 }
 0x5bb   : > { %v1139_v32 = vmul.f32 %v1138_v31, %v1138_v31 }
 0x5bd   : > { %v1140_v34 = vsel %vm1122_vm11, %v1139_v32, 0.0 }
 0x5be   : > { %v1141_v35 = vrot.slane %v1140_v34, 4 }
 0x5c0   : > { %v1142_v36 = vadd.f32 %v1141_v35, %v1140_v34  ;;  %v1213_v34 = vperm.slane %v2484_v7, 3  ;;  %v1230_v35 = vperm.slane %v2484_v7, 4 }
 0x5c2   : > { %v1143_v37 = vrot.slane %v1142_v36, 2 }
 0x5c4   : > { %v1144_v39 = vadd.f32 %v1143_v37, %v1142_v36 }
 0x5c6   : > { %v1145_v40 = vrot.slane %v1144_v39, 1 }
 0x5c8   : > { %v1146_v41 = vadd.f32 %v1145_v40, %v1144_v39 }
 0x5ca   : > { %v1147_v42 = vmul.f32 %v1146_v41, %v2402_v28 }
 0x5cc   : > { %v1148_v43 = vadd.f32 1e-05, %v1147_v42  ;;  %v1239_v42 = vperm.slane %v2484_v7, 5 }
 0x5ce   : > { %1933 = vrsqrt.f32 %v1148_v43  ;;  %vm1155_vm15 = vweird.f32 %v1148_v43 }
 0x5d4   : > { %v1934_v38 = vpop.eup %1933 }
 0x5d5   : > { %v1150_v44 = vmul.f32 %v1934_v38, %v1148_v43  ;;  %vm1156_vm14 = vweird.f32 %v1934_v38 }
 0x5d6   : > { %vm1157_vm1 = vmor %vm1155_vm15, %vm1156_vm14 }
 0x5d7   : > { %v1151_v45 = vmul.f32 %v1934_v38, %v1150_v44 }
 0x5d9   : > { %v1152_v46 = vmul.f32 0.5, %v1151_v45 }
 0x5db   : > { %v1153_v47 = vsub.f32 1.5, %v1152_v46 }
 0x5dd   : > { %v1154_v49 = vmul.f32 %v1934_v38, %v1153_v47 }
 0x5df   : > { %v1158_v51 = vsel %vm1157_vm1, %v1934_v38, %v1154_v49 }
 0x5e0   : > { %v1159_v8 = vmul.f32 %v1158_v51, %v1138_v31 }
 0x5e2   : > { %v1161_v0 = vmul.f32 %v1160_v50, %v1159_v8 }
 0x5e4   : > { %v2408_v33 = vadd.f32 %v1162_v52, %v1161_v0  ;;  %v1248_v0 = vperm.slane %v2484_v7, 6 }
 0x5e6   : > { %1167 = vst.msk [vmem:[#allocation5 + $0x8] sm:$0xf] %vm1122_vm11, %v2408_v33 }
 0x5ed   : > { %v2412_v53 = vld [vmem:[#allocation5 + $0x6] sm:$0xf]  ;;  %v2464_v56 = vld [vmem:[#allocation5 + $0xa] sm:$0xf] }
 0x5ee   : > { %1177 = vrot.lane.b32.xlu2 %v2412_v53, %s2080_s19  ;;  %1189 = vrot.lane.b32.xlu1 %v2412_v53, %s2725_s1  ;;  %v2425_v24 = vld [vmem:[#allocation5 + $0x7] sm:$0xf] }
 0x5ef   : > { %1174 = vrot.lane.b32.xlu0 %v2412_v53, %s2726_s29  ;;  %v2438_v54 = vld [vmem:[#allocation5 + $0x8] sm:$0xf] }
 0x5f0   : > { %v2451_v55 = vld [vmem:[#allocation5 + $0x9] sm:$0xf] }
 0x5f6   : > { %1207 = vrot.lane.b32.xlu2 %v2412_v53, %s2087_s21  ;;  %1198 = vrot.lane.b32.xlu1 %v2412_v53, %s2088_s22 }
 0x5f7   : > { %1180 = vrot.lane.b32.xlu0 %v2412_v53, %s2727_s23 }
 0x5fe   : > { %1224 = vrot.lane.b32.xlu2 %v2425_v24, %s2727_s23  ;;  %1221 = vrot.lane.b32.xlu1 %v2425_v24, %s2080_s19 }
 0x5ff   : > { %1218 = vrot.lane.b32.xlu0 %v2425_v24, %s2726_s29 }
 0x606   : > { %1251 = vrot.lane.b32.xlu2 %v2425_v24, %s2087_s21  ;;  %1242 = vrot.lane.b32.xlu1 %v2425_v24, %s2088_s22 }
 0x607   : > { %1233 = vrot.lane.b32.xlu0 %v2425_v24, %s2725_s1 }
 0x60e   : > { %1268 = vrot.lane.b32.xlu2 %v2438_v54, %s2727_s23  ;;  %1265 = vrot.lane.b32.xlu1 %v2438_v54, %s2080_s19 }
 0x60f   : > { %1262 = vrot.lane.b32.xlu0 %v2438_v54, %s2726_s29 }
 0x616   : > { %1295 = vrot.lane.b32.xlu2 %v2438_v54, %s2087_s21  ;;  %1286 = vrot.lane.b32.xlu1 %v2438_v54, %s2088_s22 }
 0x617   : > { %1277 = vrot.lane.b32.xlu0 %v2438_v54, %s2725_s1 }
 0x61e   : > { %1312 = vrot.lane.b32.xlu2 %v2451_v55, %s2727_s23  ;;  %1309 = vrot.lane.b32.xlu1 %v2451_v55, %s2080_s19 }
 0x61f   : > { %1306 = vrot.lane.b32.xlu0 %v2451_v55, %s2726_s29 }
 0x626   : > { %1339 = vrot.lane.b32.xlu2 %v2451_v55, %s2087_s21  ;;  %1330 = vrot.lane.b32.xlu1 %v2451_v55, %s2088_s22 }
 0x627   : > { %1321 = vrot.lane.b32.xlu0 %v2451_v55, %s2725_s1 }
 0x62e   : > { %1356 = vrot.lane.b32.xlu2 %v2464_v56, %s2727_s23  ;;  %1353 = vrot.lane.b32.xlu1 %v2464_v56, %s2080_s19  ;;  %s1630_s19 = sshll.u32 %s611_s27, 4  ;;  %s1631_s19 = int_to_ptr.vmem [resolvable:$true] %s1630_s19 }
 0x62f   : > { %1350 = vrot.lane.b32.xlu0 %v2464_v56, %s2726_s29 }
 0x636   : > { %1383 = vrot.lane.b32.xlu2 %v2464_v56, %s2087_s21  ;;  %1374 = vrot.lane.b32.xlu1 %v2464_v56, %s2088_s22  ;;  %s2728_s22 = sld [smem:[#allocation21_spill]] }
 0x637   : > { %1365 = vrot.lane.b32.xlu0 %v2464_v56, %s2725_s1  ;;  %s1810_s1 = sshll.u32 %s2205_s0, 2 }
 0x63c   : > { %s620_s23 = scalar_lea.vmem %s2728_s22, %s1737_s24 }
 0x648   : > { %v1178_v57 = vpop.permute.xlu2 %1177 }
 0x650   : > { %v1208_v58 = vpop.permute.xlu2 %1207 }
 0x658   : > { %v1225_v61 = vpop.permute.xlu2 %1224 }
 0x660   : > { %v1190_v59 = vpop.permute.xlu1 %1189  ;;  %v1252_v1 = vpop.permute.xlu2 %1251 }
 0x661   : > { %v1175_v60 = vpop.permute.xlu0 %1174  ;;  %v1192_v4 = vsel %vm624_vm0, %v1190_v59, %v2412_v53 }
 0x662   : > { %v1183_v5 = vsel %vm624_vm0, %v2412_v53, %v1175_v60  ;;  %v1193_v10 = vsel %vm676_vm2, %v1192_v4, %v1175_v60 }
 0x663   : > { %v1184_v11 = vsel %vm676_vm2, %v1183_v5, %v1178_v57  ;;  %v1194_v17 = vsel %vm679_vm5, %v1193_v10, %v1178_v57 }
 0x664   : > { %v1196_v23 = vmul.f32 %v1195_v16, %v1194_v17 }
 0x668   : > { %v1199_v62 = vpop.permute.xlu1 %1198  ;;  %v1269_v6 = vpop.permute.xlu2 %1268 }
 0x669   : > { %v1181_v63 = vpop.permute.xlu0 %1180  ;;  %v1201_v9 = vsel %vm624_vm0, %v1199_v62, %v1190_v59  ;;  %v1210_v21 = vsel %vm624_vm0, %v1208_v58, %v1199_v62 }
 0x66a   : > { %v1185_v13 = vsel %vm679_vm5, %v1184_v11, %v1181_v63  ;;  %v1202_v15 = vsel %vm676_vm2, %v1201_v9, %v2412_v53  ;;  %v1211_v27 = vsel %vm676_vm2, %v1210_v21, %v1190_v59  ;;  %v2523_v59 = vld [vmem:[%s2688_s10 + $0x8] sm:$0xff] }
 0x66b   : > { %v1187_v19 = vmul.f32 %v1186_v12, %v1185_v13  ;;  %v1203_v20 = vsel %vm679_vm5, %v1202_v15, %v1175_v60  ;;  %v1212_v39 = vsel %vm679_vm5, %v1211_v27, %v2412_v53  ;;  %v1274_v4 = vperm.slane %v2523_v59, 0 }
 0x66c   : > { %v1205_v26 = vmul.f32 %v1204_v18, %v1203_v20  ;;  %v1214_v44 = vmul.f32 %v1213_v34, %v1212_v39  ;;  %v1283_v11 = vperm.slane %v2523_v59, 1  ;;  %v1292_v21 = vperm.slane %v2523_v59, 2 }
 0x66d   : > { %v1197_v29 = vadd.f32 %v1196_v23, %v1187_v19  ;;  %v1327_v39 = vperm.slane %v2523_v59, 5 }
 0x66f   : > { %v1206_v41 = vadd.f32 %v1205_v26, %v1197_v29  ;;  %v1301_v29 = vperm.slane %v2523_v59, 3 }
 0x670   : > { %v1222_v2 = vpop.permute.xlu1 %1221  ;;  %v1296_v31 = vpop.permute.xlu2 %1295 }
 0x671   : > { %v1219_v3 = vpop.permute.xlu0 %1218  ;;  %v1215_v46 = vadd.f32 %v1214_v44, %v1206_v41 }
 0x672   : > { %v1227_v22 = vsel %vm624_vm0, %v2425_v24, %v1219_v3 }
 0x673   : > { %v1228_v30 = vsel %vm676_vm2, %v1227_v22, %v1222_v2 }
 0x674   : > { %v1229_v40 = vsel %vm679_vm5, %v1228_v30, %v1225_v61 }
 0x675   : > { %v1231_v45 = vmul.f32 %v1230_v35, %v1229_v40 }
 0x677   : > { %v1232_v52 = vadd.f32 %v1231_v45, %v1215_v46 }
 0x678   : > { %v1243_v14 = vpop.permute.xlu1 %1242  ;;  %v1313_v57 = vpop.permute.xlu2 %1312 }
 0x679   : > { %v1234_v48 = vpop.permute.xlu0 %1233  ;;  %v1254_v50 = vsel %vm624_vm0, %v1252_v1, %v1243_v14  ;;  %v1257_v1 = vperm.slane %v2484_v7, 7 }
 0x67a   : > { %v1236_v25 = vsel %vm624_vm0, %v1234_v48, %v2425_v24  ;;  %v1245_v38 = vsel %vm624_vm0, %v1243_v14, %v1234_v48  ;;  %v1255_v62 = vsel %vm676_vm2, %v1254_v50, %v1234_v48 }
 0x67b   : > { %v1237_v36 = vsel %vm676_vm2, %v1236_v25, %v1219_v3  ;;  %v1246_v49 = vsel %vm676_vm2, %v1245_v38, %v2425_v24  ;;  %v1256_v5 = vsel %vm679_vm5, %v1255_v62, %v2425_v24 }
 0x67c   : > { %v1238_v43 = vsel %vm679_vm5, %v1237_v36, %v1222_v2  ;;  %v1247_v58 = vsel %vm679_vm5, %v1246_v49, %v1219_v3  ;;  %v1258_v15 = vmul.f32 %v1257_v1, %v1256_v5 }
 0x67d   : > { %v1240_v47 = vmul.f32 %v1239_v42, %v1238_v43  ;;  %v1249_v2 = vmul.f32 %v1248_v0, %v1247_v58  ;;  %v1171_v0 = vld [vmem:[%s2688_s10 + $0x10] sm:$0xf] }
 0x67f   : > { %v1241_v61 = vadd.f32 %v1240_v47, %v1232_v52 }
 0x680   : > { %v1266_v32 = vpop.permute.xlu1 %1265  ;;  %v1340_v19 = vpop.permute.xlu2 %1339 }
 0x681   : > { %v1263_v37 = vpop.permute.xlu0 %1262  ;;  %v1250_v10 = vadd.f32 %v1249_v2, %v1241_v61  ;;  %v1345_v61 = vperm.slane %v2523_v59, 7 }
 0x682   : > { %v1271_v51 = vsel %vm624_vm0, %v2438_v54, %v1263_v37 }
 0x683   : > { %v1272_v63 = vsel %vm676_vm2, %v1271_v51, %v1266_v32  ;;  %v1259_v48 = vadd.f32 %v1258_v15, %v1250_v10  ;;  %v1336_v51 = vperm.slane %v2523_v59, 6 }
 0x684   : > { %v1273_v9 = vsel %vm679_vm5, %v1272_v63, %v1269_v6  ;;  %v1362_v63 = vperm.slane %v1171_v0, 0 }
 0x685   : > { %v1275_v7 = vmul.f32 %v1274_v4, %v1273_v9 }
 0x687   : > { %v1276_v20 = vadd.f32 %v1275_v7, %v1259_v48 }
 0x688   : > { %v1287_v8 = vpop.permute.xlu1 %1286  ;;  %v1357_v44 = vpop.permute.xlu2 %1356 }
 0x689   : > { %v1278_v53 = vpop.permute.xlu0 %1277  ;;  %v1298_v24 = vsel %vm624_vm0, %v1296_v31, %v1287_v8 }
 0x68a   : > { %v1280_v60 = vsel %vm624_vm0, %v1278_v53, %v2438_v54  ;;  %v1289_v13 = vsel %vm624_vm0, %v1287_v8, %v1278_v53  ;;  %v1299_v25 = vsel %vm676_vm2, %v1298_v24, %v1278_v53  ;;  %v1389_v24 = vperm.slane %v1171_v0, 3 }
 0x68b   : > { %v1281_v3 = vsel %vm676_vm2, %v1280_v60, %v1263_v37  ;;  %v1290_v18 = vsel %vm676_vm2, %v1289_v13, %v2438_v54  ;;  %v1300_v34 = vsel %vm679_vm5, %v1299_v25, %v2438_v54 }
 0x68c   : > { %v1282_v12 = vsel %vm679_vm5, %v1281_v3, %v1266_v32  ;;  %v1291_v22 = vsel %vm679_vm5, %v1290_v18, %v1263_v37  ;;  %v1318_v32 = vperm.slane %v2523_v59, 4  ;;  %v1302_v43 = vmul.f32 %v1301_v29, %v1300_v34  ;;  %v1824_v34 = vld [vmem:[%s2690_s12 + $0x8] sm:$0xff] }
 0x68d   : > { %v1284_v17 = vmul.f32 %v1283_v11, %v1282_v12  ;;  %v1293_v30 = vmul.f32 %v1292_v21, %v1291_v22  ;;  %v1371_v12 = vperm.slane %v1171_v0, 1  ;;  %1457 = vmatpush.bf16.msrb.mxu3 %v1824_v34  ;;  %v1827_v34 = vld [vmem:[%s2692_s14] sm:$0xff] }
 0x68f   : > { %v1285_v23 = vadd.f32 %v1284_v17, %v1276_v20  ;;  %v2587_v20 = vld [vmem:[%s2689_s11] sm:$0x7f] }
 0x690   : > { %v1310_v14 = vpop.permute.xlu1 %1309  ;;  %v1384_v3 = vpop.permute.xlu2 %1383  ;;  %v1392_v25 = vperm.slane %v2587_v20, 0 }
 0x691   : > { %v1307_v16 = vpop.permute.xlu0 %1306  ;;  %v1294_v37 = vadd.f32 %v1293_v30, %v1285_v23 }
 0x692   : > { %v1315_v6 = vsel %vm624_vm0, %v2451_v55, %v1307_v16 }
 0x693   : > { %v1316_v26 = vsel %vm676_vm2, %v1315_v6, %v1310_v14  ;;  %v1303_v45 = vadd.f32 %v1302_v43, %v1294_v37 }
 0x694   : > { %v1317_v35 = vsel %vm679_vm5, %v1316_v26, %v1313_v57 }
 0x695   : > { %v1319_v38 = vmul.f32 %v1318_v32, %v1317_v35 }
 0x697   : > { %v1320_v50 = vadd.f32 %v1319_v38, %v1303_v45 }
 0x698   : > { %v1331_v27 = vpop.permute.xlu1 %1330 }
 0x699   : > { %v1322_v31 = vpop.permute.xlu0 %1321  ;;  %v1342_v47 = vsel %vm624_vm0, %v1340_v19, %v1331_v27 }
 0x69a   : > { %v1324_v36 = vsel %vm624_vm0, %v1322_v31, %v2451_v55  ;;  %v1333_v42 = vsel %vm624_vm0, %v1331_v27, %v1322_v31  ;;  %v1343_v58 = vsel %vm676_vm2, %v1342_v47, %v1322_v31 }
 0x69b   : > { %v1325_v40 = vsel %vm676_vm2, %v1324_v36, %v1307_v16  ;;  %v1334_v54 = vsel %vm676_vm2, %v1333_v42, %v2451_v55  ;;  %v1344_v1 = vsel %vm679_vm5, %v1343_v58, %v2451_v55 }
 0x69c   : > { %v1326_v41 = vsel %vm679_vm5, %v1325_v40, %v1310_v14  ;;  %v1335_v52 = vsel %vm679_vm5, %v1334_v54, %v1307_v16  ;;  %v1346_v9 = vmul.f32 %v1345_v61, %v1344_v1  ;;  %v1380_v14 = vperm.slane %v1171_v0, 2 }
 0x69d   : > { %v1328_v46 = vmul.f32 %v1327_v39, %v1326_v41  ;;  %v1337_v62 = vmul.f32 %v1336_v51, %v1335_v52  ;;  %v1426_v61 = vperm.slane %v2587_v20, 1  ;;  %v1428_v1 = vperm.slane %v2587_v20, 2 }
 0x69f   : > { %v1329_v57 = vadd.f32 %v1328_v46, %v1320_v50 }
 0x6a0   : > { %v1354_v49 = vpop.permute.xlu1 %1353 }
 0x6a1   : > { %v1351_v8 = vpop.permute.xlu0 %1350  ;;  %v1338_v4 = vadd.f32 %v1337_v62, %v1329_v57 }
 0x6a2   : > { %v1359_v53 = vsel %vm624_vm0, %v2464_v56, %v1351_v8 }
 0x6a3   : > { %v1360_v60 = vsel %vm676_vm2, %v1359_v53, %v1354_v49  ;;  %v1347_v7 = vadd.f32 %v1346_v9, %v1338_v4  ;;  %v1825_v9 = vld [vmem:[%s2691_s13] sm:$0xff] }
 0x6a4   : > { %v1361_v2 = vsel %vm679_vm5, %v1360_v60, %v1357_v44 }
 0x6a5   : > { %v1363_v10 = vmul.f32 %v1362_v63, %v1361_v2 }
 0x6a7   : > { %v1364_v19 = vadd.f32 %v1363_v10, %v1347_v7  ;;  %v1435_v10 = vperm.slane %v2587_v20, 3 }
 0x6a8   : > { %v1375_v5 = vpop.permute.xlu1 %1374 }
 0x6a9   : > { %v1386_v11 = vsel %vm624_vm0, %v1384_v3, %v1375_v5  ;;  %v1366_v13 = vpop.permute.xlu0 %1365 }
 0x6aa   : > { %v1368_v59 = vsel %vm624_vm0, %v1366_v13, %v2464_v56  ;;  %v1377_v15 = vsel %vm624_vm0, %v1375_v5, %v1366_v13  ;;  %v1387_v48 = vsel %vm676_vm2, %v1386_v11, %v1366_v13  ;;  %v1826_v5 = vld [vmem:[%s2691_s13 + $0x8] sm:$0xff] }
 0x6ab   : > { %v1369_v55 = vsel %vm676_vm2, %v1368_v59, %v1351_v8  ;;  %v1378_v16 = vsel %vm676_vm2, %v1377_v15, %v2464_v56  ;;  %v1388_v21 = vsel %vm679_vm5, %v1387_v48, %v2464_v56  ;;  %v1823_v56 = vld [vmem:[%s2690_s12] sm:$0xff]  ;;  %1492 = vmatpush.bf16.msrb.mxu1 %v1826_v5  ;;  %v1470_v15 = vperm.slane %v2587_v20, 4 }
 0x6ac   : > { %v1370_v17 = vsel %vm679_vm5, %v1369_v55, %v1354_v49  ;;  %v1379_v18 = vsel %vm679_vm5, %v1378_v16, %v1351_v8  ;;  %v1390_v27 = vmul.f32 %v1389_v24, %v1388_v21  ;;  %1458 = vmatpush.bf16.msrb.mxu3 %v1823_v56 }
 0x6ad   : > { %v1372_v6 = vmul.f32 %v1371_v12, %v1370_v17  ;;  %v1381_v23 = vmul.f32 %v1380_v14, %v1379_v18 }
 0x6af   : > { %v1373_v22 = vadd.f32 %v1372_v6, %v1364_v19  ;;  %1493 = vmatpush.bf16.msrb.mxu1 %v1825_v9  ;;  %v1922_v9 = vld [vmem:[%s2695_s17] ss:$0 sm:$0xff] }
 0x6b1   : > { %v1382_v26 = vadd.f32 %v1381_v23, %v1373_v22 }
 0x6b3   : > { %v1391_v29 = vadd.f32 %v1390_v27, %v1382_v26 }
 0x6b5   : > { %v1393_v30 = vadd.f32 %v1392_v25, %v1391_v29 }
 0x6b7   : > { %v1394_v32 = vmax.f32 %v1393_v30, 0.0  ;;  %v1828_v30 = vld [vmem:[%s2692_s14 + $0x8] sm:$0xff] }
 0x6b8   : > { %1565 = vmatpush.bf16.msra.mxu0 %v1828_v30 }
 0x6b9   : > { %v1395_v31 = vadd.f32 %v1394_v32, %v2408_v33 }
 0x6bb   : > { %v1396_v35 = vsel %vm1122_vm11, %v1395_v31, 0.0 }
 0x6bc   : > { %v1397_v36 = vrot.slane %v1396_v35, 4  ;;  %1566 = vmatpush.bf16.msra.mxu0 %v1827_v34 }
 0x6be   : > { %v1398_v37 = vadd.f32 %v1397_v36, %v1396_v35 }
 0x6c0   : > { %v1399_v39 = vrot.slane %v1398_v37, 2 }
 0x6c2   : > { %v1400_v40 = vadd.f32 %v1399_v39, %v1398_v37 }
 0x6c4   : > { %v1401_v41 = vrot.slane %v1400_v40, 1 }
 0x6c6   : > { %v1402_v42 = vadd.f32 %v1401_v41, %v1400_v40 }
 0x6c8   : > { %v1403_v33 = vmul.f32 %v1402_v42, %v2402_v28 }
 0x6ca   : > { %v1404_v43 = vsub.f32 %v1395_v31, %v1403_v33 }
 0x6cc   : > { %v1405_v38 = vmul.f32 %v1404_v43, %v1404_v43 }
 0x6ce   : > { %v1406_v44 = vsel %vm1122_vm11, %v1405_v38, 0.0 }
 0x6cf   : > { %v1407_v45 = vrot.slane %v1406_v44, 4 }
 0x6d1   : > { %v1408_v46 = vadd.f32 %v1407_v45, %v1406_v44  ;;  %v1530_v44 = vperm.slane %v2587_v20, 5 }
 0x6d3   : > { %v1409_v54 = vrot.slane %v1408_v46, 2 }
 0x6d5   : > { %v1410_v47 = vadd.f32 %v1409_v54, %v1408_v46  ;;  %v1532_v54 = vperm.slane %v2587_v20, 6 }
 0x6d7   : > { %v1411_v49 = vrot.slane %v1410_v47, 1 }
 0x6d9   : > { %v1412_v50 = vadd.f32 %v1411_v49, %v1410_v47 }
 0x6db   : > { %v1413_v51 = vmul.f32 %v1412_v50, %v2402_v28  ;;  %v1921_v50 = vld [vmem:[%s2693_s15] ss:$0 sm:$0xff] }
 0x6dd   : > { %v1414_v8 = vadd.f32 1e-05, %v1413_v51 }
 0x6df   : > { %1935 = vrsqrt.f32 %v1414_v8  ;;  %vm1421_vm6 = vweird.f32 %v1414_v8 }
 0x6e5   : > { %v1936_v52 = vpop.eup %1935 }
 0x6e6   : > { %v1416_v0 = vmul.f32 %v1936_v52, %v1414_v8  ;;  %vm1422_vm2 = vweird.f32 %v1936_v52  ;;  %v1534_v8 = vld [vmem:[%s620_s23] sm:$0xf]  ;;  %s1628_s23 = scalar_lea.hbm %s2696_s18, %s1810_s1  ;;  %s2023_s1 = scalar_lea.hbm %s2696_s18, 8 }
 0x6e7   : > { %vm1423_vm7 = vmor %vm1421_vm6, %vm1422_vm2  ;;  %s1632_s3 = sshll.u32 %s1628_s23, 4  ;;  %s1633_s3 = int_to_ptr.hbm [resolvable:$true] %s1632_s3 }
 0x6e8   : > { %v1417_v53 = vmul.f32 %v1936_v52, %v1416_v0  ;;  %s2017_s20 = sshra.s32 %s1633_s3, 4  ;;  %s2018_s20 = int_to_ptr.hbm [resolvable:$true] %s2017_s20 }
 0x6e9   : > { %s2019_s0 = scalar_lea.hbm %s2018_s20, 4  ;;  %p2024_p3 = scmp.lt.s32.totalorder %s2018_s20, %s2696_s18 }
 0x6ea   : > { %v1418_v57 = vmul.f32 0.5, %v1417_v53  ;;  %p2020_p0 = scmp.ne.s32.totalorder %s2018_s20, %s2019_s0  ;;  %p2025_p4 = scmp.lt.s32.totalorder %s2023_s1, %s2019_s0 }
 0x6ec   : > { %v1419_v58 = vsub.f32 1.5, %v1418_v57  ;;  %p2021_p1 = pnand %p2020_p0, %p2222_p5  ;;  %p2026_p7 = por %p2025_p4, %p2024_p3 }
 0x6ee   : > { %v1420_v60 = vmul.f32 %v1936_v52, %v1419_v58  ;;  %p2022_p2 = pneg %p2021_p1 }
 0x6f0   : > { %v1424_v62 = vsel %vm1423_vm7, %v1936_v52, %v1420_v60  ;;  %p2027_p8 = pnand %p2026_p7, %p2022_p2 }
 0x6f1   : > { %v1425_v63 = vmul.f32 %v1424_v62, %v1404_v43 }
 0x6f3   : > { %v1427_v2 = vmul.f32 %v1426_v61, %v1425_v63  ;;  %v1586_v63 = vld [vmem:[%s2694_s16] sm:$0xf] }
 0x6f5   : > { %v1429_v4 = vadd.f32 %v1428_v1, %v1427_v2  ;;  %v1595_v1 = vsel %vm738_vm4, %v1586_v63, 0 }
 0x6f6   : > { %1604 = vmatpush.bf16.msra.mxu3 %v1595_v1 }
 0x6f7   : > { %v1430_v3 = vpack.c.bf16 %v1429_v4, %v1429_v4 }
 0x6f9   : > { %1789 = vmatmul.msk.bf16.vlgmr.msrb.gmra.mxu3 %vm682_vm3, %v1430_v3 }
 0x77c   : > { %v1460_v11 = vpop.f32.mrf.mxu3 }
 0x77d   : > { %v1461_v12 = vadd.f32 %v1460_v11, %v1435_v10 }
 0x77f   : > { %v1464_v13 = vmax.f32 %v1461_v12, 0.0 }
 0x781   : > { %v1465_v14 = vpack.c.bf16 %v1464_v13, %v1464_v13 }
 0x783   : > { %1798 = vmatmul.msk.bf16.vlgmr.msrb.gmra.mxu1 %vm682_vm3, %v1465_v14 }
 0x784   : > { %v1462_v59 = vpop.f32.mrf.mxu3 }
 0x800   : > { %v1495_v7 = vpop.f32.mrf.mxu1 }
 0x801   : > { %v1496_v55 = vadd.f32 %v1495_v7, %v1470_v15 }
 0x803   : > { %v1499_v16 = vadd.f32 %v1496_v55, %v1429_v4 }
 0x805   : > { %v1500_v48 = vsel %vm1122_vm11, %v1499_v16, 0.0 }
 0x806   : > { %v1501_v17 = vrot.slane %v1500_v48, 4 }
 0x808   : > { %v1502_v18 = vadd.f32 %v1501_v17, %v1500_v48  ;;  %v1497_v19 = vpop.f32.mrf.mxu1 }
 0x80a   : > { %v1503_v24 = vrot.slane %v1502_v18, 2 }
 0x80c   : > { %v1504_v6 = vadd.f32 %v1503_v24, %v1502_v18 }
 0x80e   : > { %v1505_v21 = vrot.slane %v1504_v6, 1 }
 0x810   : > { %v1506_v22 = vadd.f32 %v1505_v21, %v1504_v6 }
 0x812   : > { %v1507_v23 = vmul.f32 %v1506_v22, %v2402_v28 }
 0x814   : > { %v1508_v25 = vsub.f32 %v1499_v16, %v1507_v23 }
 0x816   : > { %v1509_v26 = vmul.f32 %v1508_v25, %v1508_v25 }
 0x818   : > { %v1510_v27 = vsel %vm1122_vm11, %v1509_v26, 0.0  ;;  %vm1573_vm11 = vcmask 60416  }
 0x819   : > { %v1511_v29 = vrot.slane %v1510_v27, 4 }
 0x81b   : > { %v1512_v32 = vadd.f32 %v1511_v29, %v1510_v27 }
 0x81d   : > { %v1513_v31 = vrot.slane %v1512_v32, 2 }
 0x81f   : > { %v1514_v35 = vadd.f32 %v1513_v31, %v1512_v32 }
 0x821   : > { %v1515_v56 = vrot.slane %v1514_v35, 1 }
 0x823   : > { %v1516_v36 = vadd.f32 %v1515_v56, %v1514_v35 }
 0x825   : > { %v1517_v37 = vmul.f32 %v1516_v36, %v2402_v28 }
 0x827   : > { %v1518_v39 = vadd.f32 1e-05, %v1517_v37 }
 0x829   : > { %1937 = vrsqrt.f32 %v1518_v39  ;;  %vm1525_vm9 = vweird.f32 %v1518_v39 }
 0x82f   : > { %v1938_v40 = vpop.eup %1937 }
 0x830   : > { %v1520_v41 = vmul.f32 %v1938_v40, %v1518_v39  ;;  %vm1526_vm8 = vweird.f32 %v1938_v40 }
 0x831   : > { %vm1527_vm10 = vmor %vm1525_vm9, %vm1526_vm8 }
 0x832   : > { %v1521_v42 = vmul.f32 %v1938_v40, %v1520_v41 }
 0x834   : > { %v1522_v33 = vmul.f32 0.5, %v1521_v42 }
 0x836   : > { %v1523_v43 = vsub.f32 1.5, %v1522_v33 }
 0x838   : > { %v1524_v38 = vmul.f32 %v1938_v40, %v1523_v43 }
 0x83a   : > { %v1528_v45 = vsel %vm1527_vm10, %v1938_v40, %v1524_v38 }
 0x83b   : > { %v1529_v46 = vmul.f32 %v1528_v45, %v1508_v25 }
 0x83d   : > { %v1531_v47 = vmul.f32 %v1530_v44, %v1529_v46 }
 0x83f   : > { %v1533_v28 = vadd.f32 %v1532_v54, %v1531_v47 }
 0x841   : > { %v1535_v49 = vpack.c.bf16 %v1533_v28, %v1533_v28 }
 0x843   : > { %1807 = vmatmul.msk.bf16.vlgmr.msra.gmra.mxu0 %vm682_vm3, %v1535_v49 }
 0x8c0   : > { %v1568_v51 = vpop.f32.mrf.mxu0 }
 0x8c1   : > { %v1569_v52 = vadd.f32 %v1921_v50, %v1568_v51 }
 0x8c3   : > { %v1572_v0 = vadd.f32 %v1569_v52, %v1534_v8 }
 0x8c5   : > { %v1574_v20 = vsel %vm1573_vm11, %v1572_v0, -inf }
 0x8c6   : > { %1575 = vmax.xlane.f32.xlu0 %v1574_v20 }
 0x8c8   : > { %v1570_v53 = vpop.f32.mrf.mxu0 }
 0x939   : > { %v1576_v57 = vpop.xlane.xlu0 %1575 }
 0x93a   : > { %v1577_v58 = vsub.f32 %v1572_v0, %v1576_v57 }
 0x93c   : > { %v1578_v60 = vmul.f32 1.442695, %v1577_v58 }
 0x93e   : > { %1939 = vpow2.f32 %v1578_v60 }
 0x944   : > { %v1940_v61 = vpop.eup %1939 }
 0x945   : > { %v1580_v62 = vsel %vm1573_vm11, %v1940_v61, 0.0 }
 0x946   : > { %1581 = vadd.xlane.f32.xlu1 %v1580_v62 }
 0x9b9   : > { %v1582_v2 = vpop.xlane.xlu1 %1581 }
 0x9ba   : > { %1941 = vrcp.f32 %v1582_v2 }
 0x9c0   : > { %v1942_v4 = vpop.eup %1941 }
 0x9c1   : > { %v1584_v3 = vmul.f32 %v1942_v4, %v1940_v61 }
 0x9c3   : > { %v1585_v5 = vpack.c.bf16 %v1584_v3, %v1584_v3 }
 0x9c5   : > { %1808 = vmatmul.msk.bf16.vlgmr.msra.gmra.mxu3 %vm624_vm0, %v1585_v5 }
 0xa48   : > { %v1606_v10 = vpop.f32.mrf.mxu3 }
 0xa49   : > { %v1607_v11 = vadd.f32 %v1922_v9, %v1606_v10 }
 0xa4b   : > { %1611 = vrot.lane.b32.xlu2 %v1607_v11, %s2726_s29  ;;  %s1618_s29 = scalar_lea.sflag [#allocation8], %s609_s25 }
 0xa50   : > { %v1608_v12 = vpop.f32.mrf.mxu3 }
 0xaa5   : > { %v1612_v13 = vpop.permute.xlu2 %1611 }
 0xaa6   : > { %v1614_v14 = vsel %vm624_vm0, %v1569_v52, %v1612_v13 }
 0xaa7   : > { %v1615_v59 = vsel %vm679_vm5, %v1614_v14, 0.0 }
 0xaa8   : > { %1616 = vst [vmem:[%s611_s27] sm:$0xf] %v1615_v59 }
 0xaa9   : > { %2030 = shalt.err (!%p2027_p8)
}
 0xaaa   : > { %1837 = dma.vmem_to_hbm [thread:$0]  (%p2222_p5), %s1631_s19, 64, %s1633_s3, %s1618_s29  }
 0xaab PF: > { %s2729_s25 = sld [smem:[#allocation15_spill]]  ;;  %p1854_p9 = scmp.ge.s32.totalorder %s2073_s30, 2 }
 0xaad   : > { %p1847_p10 = pnand %p1854_p9, %p2226_p6 }
 0xaaf   : > { %p1848_p11 = pneg %p1847_p10 }
 0xab1   : > { %s1644_s27 = sand.u32 1, %s2729_s25  }
 0xab2   : > { %s1645_s24 = scalar_lea.sflag [#allocation8], %s1644_s27 }
 0xab3   : > { %2056 = dma.done.wait (%p1848_p11), %s1645_s24, 64  }
 0xab4   : > { %2058 = vsyncadd (%p1848_p11), %s1645_s24, 4294967232  ;;  %s2731_s30 = sld [smem:[#allocation17_spill]]  ;;  %s2734_s27 = smov %s2065_s28 }
 0xab5   : > { %s2732_s20 = sld [smem:[#allocation16_spill]] }
 0xab6   : > { %s2733_s29 = sld [smem:[#allocation18_spill]] }
 0xaba   : > { %p30_p12 = scmp.ge.s32.totalorder %s2731_s30, 4  }
 0xabb   : > { %s2735_s28 = smov %s2732_s20 }
 0xabc   :  { %32 = sbr.rel (!%p30_p12) target bundleno = 10 (0xa), region = 139 }
 0xac1   :  { %1651 = vsyncpa [#allocation7], 1 }
 0xac2   :  { %1653 = vsyncpa [#allocation7 + $0x1], 1 }
 0xac3   :  { %1654 = vsyncpa [#allocation10], 1 }
 0xac4   :  { %1655 = vsyncpa [#allocation8], 1 }
 0xac5   :  { %1657 = vsyncpa [#allocation8 + $0x1], 1 }

</bundles_post_ra>
